<compile_context>
chip_gen: v7x
topology: tpu7x:2x2x1
jax: 0.10.0
libtpu: 0.0.40
codegen_flags: <defaults>
</compile_context>

<pallas_src>
import functools

import jax
import jax.numpy as jnp
from jax.experimental import pallas as pl
from jax.experimental.pallas import tpu as pltpu


def _round_up(x, m):
    return ((x + m - 1) // m) * m


def _pad_gates(w, H, Hp):
    """Pad the trailing (3H) gate axis so each gate occupies Hp lanes: (..., 3H)->(..., 3Hp)."""
    lead = w.shape[:-1]
    w3 = w.reshape(lead + (3, H))
    out = jnp.zeros(lead + (3, Hp), w.dtype).at[..., :H].set(w3)
    return out.reshape(lead + (3 * Hp,))


def _gru_chunk_kernel(maxlen_ref, gi_ref, len_ref, whh_ref, bhn_ref,
                      out_ref, h_ref, *, hblk):
    """Grid = (batch_tile, time_chunk). One invocation advances one batch tile's GRU
    hidden state across one chunk of Tc time steps.

    maxlen_ref: (n_btiles,)    int32 SMEM  per-tile max length (scalar prefetch)
    gi_ref    : (Tc, Bt, 3*Hp) bf16  VMEM  hoisted x @ W_ih^T + (b_ih, b_hr/b_hz folded)
    len_ref   : (Bt, 1)        int32 VMEM  per-row sequence lengths
    whh_ref   : (Hp, 3*Hp)     bf16  VMEM  W_hh^T (gate-padded, single-buffered)
    bhn_ref   : (1, Hp)        f32   VMEM  b_hn (only hidden bias left in the loop)
    out_ref   : (Bt, 128)      f32   VMEM  sigmoid(h_T) for the 128-lane block with col H-1
    h_ref     : (Bt, Hp)       f32   VMEM scratch -- hidden state, persists across chunks
    """
    b = pl.program_id(0)
    tc = pl.program_id(1)
    n_tc = pl.num_programs(1)
    Tc = gi_ref.shape[0]
    Hp = whh_ref.shape[0]

    @pl.when(tc == 0)
    def _():
        h_ref[...] = jnp.zeros_like(h_ref)

    chunk_start = tc * Tc

    # Skip time chunks entirely past this tile's longest sequence (dead-step skip).
    @pl.when(chunk_start < maxlen_ref[b])
    def _():
        whh = whh_ref[...]                        # (Hp, 3Hp) bf16, resident
        bhn = bhn_ref[...]                        # (1, Hp)   f32
        lens = len_ref[...]                       # (Bt, 1)   int32, loaded once per chunk

        def step(t, h_prev):                      # h_prev: (Bt, Hp) f32
            gh = jnp.dot(h_prev.astype(jnp.bfloat16), whh,
                         preferred_element_type=jnp.float32)       # (Bt, 3Hp) f32
            # PyTorch gate order r, z, n; per-gate 128-aligned slices read from VMEM.
            r = jax.nn.sigmoid(gi_ref[t, :, 0:Hp].astype(jnp.float32)
                               + gh[:, 0:Hp])
            z = jax.nn.sigmoid(gi_ref[t, :, Hp:2 * Hp].astype(jnp.float32)
                               + gh[:, Hp:2 * Hp])
            n = jnp.tanh(gi_ref[t, :, 2 * Hp:3 * Hp].astype(jnp.float32)
                         + r * (gh[:, 2 * Hp:3 * Hp] + bhn))
            h_new = (1.0 - z) * n + z * h_prev
            # pack_padded_sequence semantics: freeze h once global t >= length.
            return jnp.where(chunk_start + t < lens, h_new, h_prev)

        h_ref[...] = jax.lax.fori_loop(0, Tc, step, h_ref[...],
                                       unroll=min(8, Tc))

    @pl.when(tc == n_tc - 1)
    def _():
        # Lane-dense single-vreg-wide slab; wrapper picks column (H-1) % 128.
        out_ref[...] = jax.nn.sigmoid(h_ref[:, hblk * 128:(hblk + 1) * 128])


def rnn_forward(tokens, lengths, emb_table, w_ih, w_hh, b_ih, b_hh):
    """tokens: (T, B) int32 (time-major), lengths: (B,) int32.
    Returns (B,) float32 == sigmoid(h_n[0, :, -1]) of the PyTorch module."""
    T, B = tokens.shape
    E = emb_table.shape[1]
    H = w_hh.shape[1]                              # w_hh: (3H, H)

    f32, bf16 = jnp.float32, jnp.bfloat16

    Hp = _round_up(H, 128)                         # each gate -> 128-lane aligned block
    G = 3 * Hp
    # Batch tile as large as possible (MXU row occupancy), up to 128, multiple of 8.
    Bt = min(128, _round_up(B, 8))
    Bp = _round_up(B, Bt)
    n_btiles = Bp // Bt
    # Time chunk sized so each double-buffered bf16 gi chunk stays <= ~4 MiB.
    Tc = max(1, min(T, (4 << 20) // (Bt * G * 2)))
    Tp = _round_up(T, Tc)
    n_tchunks = Tp // Tc

    # ---- Parameter layout: transpose + gate-pad; MXU inputs in bf16 ---------------
    wih_p = _pad_gates(w_ih.T.astype(f32), H, Hp).astype(bf16)            # (E, 3Hp)
    whh_g = _pad_gates(w_hh.T.astype(f32), H, Hp)                          # (H, 3Hp)
    whh_p = jnp.zeros((Hp, G), f32).at[:H, :].set(whh_g).astype(bf16)      # (Hp, 3Hp)
    bih3 = jnp.zeros((3, Hp), f32).at[:, :H].set(b_ih.astype(f32).reshape(3, H))
    bhh3 = jnp.zeros((3, Hp), f32).at[:, :H].set(b_hh.astype(f32).reshape(3, H))
    # Fold b_hr, b_hz into the hoisted bias; b_hn must stay inside r*(W_hn h + b_hn).
    bias_fold = jnp.concatenate([bih3[0] + bhh3[0],
                                 bih3[1] + bhh3[1],
                                 bih3[2]]).reshape(1, G)                   # (1, 3Hp)
    bhn_p = bhh3[2].reshape(1, Hp)                                         # (1, Hp)

    # ---- Pad tokens/lengths BEFORE the hoisted projection (no post-matmul pad copy)
    lengths = jnp.minimum(lengths.astype(jnp.int32), T)     # lengths > T behave as T
    tokens_p = jnp.zeros((Tp, Bp), jnp.int32).at[:T, :B].set(tokens.astype(jnp.int32))
    lens_p = jnp.zeros((Bp,), jnp.int32).at[:B].set(lengths)

    # ---- Hoisted input projection: ONE big bf16 MXU matmul over all Tp*Bp rows -----
    x = jnp.take(emb_table, tokens_p.reshape(-1), axis=0).astype(bf16)     # (Tp*Bp, E)
    gi = jnp.dot(x, wih_p, preferred_element_type=f32) + bias_fold         # (Tp*Bp, 3Hp)
    gi_p = gi.astype(bf16).reshape(Tp, Bp, G)        # bf16 storage halves HBM/VMEM traffic

    lens_2d = lens_p.reshape(Bp, 1)
    maxlen_tile = lens_p.reshape(n_btiles, Bt).max(axis=1)                 # (n_btiles,)

    hblk = (H - 1) // 128

    # Single-buffer the loop-invariant weight blocks (constant index_map).
    wpipe = {"pipeline_mode": pl.Buffered(1)} if hasattr(pl, "Buffered") else {}

    vmem_bytes = (2 * Tc * Bt * G * 2      # gi chunk, double-buffered, bf16
                  + Hp * G * 2             # W_hh^T, single-buffered, bf16
                  + 2 * Hp * 4             # b_hn
                  + 4 * Bt * 4             # lengths
                  + 2 * Bt * 128 * 4       # output slab
                  + Bt * Hp * 4)           # hidden-state scratch
    vmem_limit = int(max(16 << 20, min(2 * vmem_bytes, 64 << 20)))

    out_p = pl.pallas_call(
        functools.partial(_gru_chunk_kernel, hblk=hblk),
        out_shape=jax.ShapeDtypeStruct((Bp, 128), f32),
        grid_spec=pltpu.PrefetchScalarGridSpec(
            num_scalar_prefetch=1,                                # per-tile max len -> SMEM
            grid=(n_btiles, n_tchunks),                           # (batch tiles, time chunks)
            in_specs=[
                pl.BlockSpec((Tc, Bt, G), lambda b, t, ml: (t, b, 0)),    # gi time chunk
                pl.BlockSpec((Bt, 1), lambda b, t, ml: (b, 0)),           # lengths
                pl.BlockSpec((Hp, G), lambda b, t, ml: (0, 0), **wpipe),  # W_hh^T (resident)
                pl.BlockSpec((1, Hp), lambda b, t, ml: (0, 0), **wpipe),  # b_hn   (resident)
            ],
            out_specs=pl.BlockSpec((Bt, 128), lambda b, t, ml: (b, 0)),   # lane-dense slab
            scratch_shapes=[pltpu.VMEM((Bt, Hp), f32)],                   # hidden state
        ),
        compiler_params=pltpu.CompilerParams(
            dimension_semantics=("parallel", "arbitrary"),        # batch shards -> megacore/2nd TC
            vmem_limit_bytes=vmem_limit),
    )(maxlen_tile, gi_p, lens_2d, whh_p, bhn_p)

    return out_p[:B, (H - 1) % 128]                               # (B,) = sigmoid(h_n[0,:,-1])


def _gru_reference(tokens, lengths, emb_table, w_ih, w_hh, b_ih, b_hh):
    """Pure-JAX f32 reference matching torch: Embedding -> GRU(packed) -> sigmoid(h_n[0,:,-1])."""
    T, B = tokens.shape
    H = w_hh.shape[1]
    x = emb_table[tokens]                                          # (T, B, E)

    def step(h, xs):
        x_t, t = xs
        gi = x_t @ w_ih.T + b_ih                                   # (B, 3H)
        gh = h @ w_hh.T + b_hh                                     # (B, 3H)
        r = jax.nn.sigmoid(gi[:, :H] + gh[:, :H])
        z = jax.nn.sigmoid(gi[:, H:2 * H] + gh[:, H:2 * H])
        n = jnp.tanh(gi[:, 2 * H:] + r * gh[:, 2 * H:])
        h_new = (1.0 - z) * n + z * h
        h = jnp.where((t < lengths)[:, None], h_new, h)
        return h, None

    h0 = jnp.zeros((B, H), jnp.float32)
    h_fin, _ = jax.lax.scan(step, h0, (x, jnp.arange(T)))
    return jax.nn.sigmoid(h_fin[:, -1])


if __name__ == "__main__":
    # Small, deterministic synthetic setup consistent with the module.
    T, B = 8, 4            # seq_len, batch
    VOCAB = 20
    E = 16                 # embedding_dim
    H = 10                 # hidden_dim (module default)

    key = jax.random.PRNGKey(0)
    k_emb, k_wih, k_whh, k_bih, k_bhh, k_tok = jax.random.split(key, 6)

    emb_table = jax.random.normal(k_emb, (VOCAB, E), dtype=jnp.float32)
    # torch.nn.GRU parameter shapes: weight_ih_l0 (3H, E), weight_hh_l0 (3H, H)
    w_ih = 0.1 * jax.random.normal(k_wih, (3 * H, E), dtype=jnp.float32)
    w_hh = 0.1 * jax.random.normal(k_whh, (3 * H, H), dtype=jnp.float32)
    b_ih = 0.1 * jax.random.normal(k_bih, (3 * H,), dtype=jnp.float32)
    b_hh = 0.1 * jax.random.normal(k_bhh, (3 * H,), dtype=jnp.float32)

    tokens = jax.random.randint(k_tok, (T, B), 0, VOCAB, dtype=jnp.int32)
    # pack_padded_sequence expects descending lengths; masking handles any order.
    lengths = jnp.array([8, 6, 5, 3], dtype=jnp.int32)

    out = rnn_forward(tokens, lengths, emb_table, w_ih, w_hh, b_ih, b_hh)
    out = jax.block_until_ready(out)
    assert out.shape == (B,)

    ref = _gru_reference(tokens, lengths, emb_table, w_ih, w_hh, b_ih, b_hh)
    assert jnp.allclose(out, ref, atol=2e-2, rtol=2e-2), (out, ref)
    print("KERNEL_OK")
</pallas_src>

<mosaic_0001>
module attributes {stable_mosaic.version = 11 : i64} {
  func.func @_gru_chunk_kernel(%arg0: i32, %arg1: i32, %arg2: memref<1xi32, #tpu.memory_space<smem>>, %arg3: memref<8x8x384xbf16, #tpu.memory_space<vmem>>, %arg4: memref<8x1xi32, #tpu.memory_space<vmem>>, %arg5: memref<128x384xbf16, #tpu.memory_space<vmem>>, %arg6: memref<1x128xf32, #tpu.memory_space<vmem>>, %arg7: memref<8x128xf32, #tpu.memory_space<vmem>>, %arg8: memref<8x128xf32, #tpu.memory_space<vmem>>) attributes {dimension_semantics = [#tpu.dimension_semantics<parallel>, #tpu.dimension_semantics<arbitrary>], iteration_bounds = array<i64: 1, 1>, scalar_prefetch = 1 : i64, scratch_operands = 1 : i64, tpu.core_type = #tpu.core_type<tc>, window_params = [{transform_indices = @transform_0, window_bounds = array<i64: 8, 8, 384>}, {transform_indices = @transform_1, window_bounds = array<i64: 8, 1>}, {pipeline_mode = #tpu.pipeline_mode<synchronous>, transform_indices = @transform_2, window_bounds = array<i64: 128, 384>}, {pipeline_mode = #tpu.pipeline_mode<synchronous>, transform_indices = @transform_3, window_bounds = array<i64: 1, 128>}, {transform_indices = @transform_4, window_bounds = array<i64: 8, 128>}]} {
    %c0_i32 = arith.constant 0 : i32
    %0 = arith.cmpi eq, %arg1, %c0_i32 : i32
    %1 = arith.extui %0 : i1 to i32
    %c0_i32_0 = arith.constant 0 : i32
    %2 = arith.cmpi ne, %1, %c0_i32_0 : i32
    scf.if %2 {
      %cst = arith.constant 0.000000e+00 : f32
      %12 = vector.broadcast %cst : f32 to vector<8x128xf32>
      %c0 = arith.constant 0 : index
      %c0_4 = arith.constant 0 : index
      %13 = vector.load %arg8[%c0, %c0_4] : memref<8x128xf32, #tpu.memory_space<vmem>>, vector<8x128xf32>
      tpu.vector_store %arg8[%c0, %c0_4], %12 {strides = array<i32>} : memref<8x128xf32, #tpu.memory_space<vmem>>, vector<8x128xf32>,
    } else {
    }
    %c8_i32 = arith.constant 8 : i32
    %3 = arith.muli %arg1, %c8_i32 : i32
    %4 = arith.index_cast %arg0 : i32 to index
    %5 = memref.load %arg2[%4] : memref<1xi32, #tpu.memory_space<smem>>
    %6 = arith.cmpi slt, %3, %5 : i32
    %7 = arith.extui %6 : i1 to i32
    %c0_i32_1 = arith.constant 0 : i32
    %8 = arith.cmpi ne, %7, %c0_i32_1 : i32
    scf.if %8 {
      %c0 = arith.constant 0 : index
      %c0_4 = arith.constant 0 : index
      %12 = vector.load %arg5[%c0, %c0_4] : memref<128x384xbf16, #tpu.memory_space<vmem>>, vector<128x384xbf16>
      %c0_5 = arith.constant 0 : index
      %c0_6 = arith.constant 0 : index
      %13 = vector.load %arg6[%c0_5, %c0_6] : memref<1x128xf32, #tpu.memory_space<vmem>>, vector<1x128xf32>
      %c0_7 = arith.constant 0 : index
      %c0_8 = arith.constant 0 : index
      %14 = vector.load %arg4[%c0_7, %c0_8] : memref<8x1xi32, #tpu.memory_space<vmem>>, vector<8x1xi32>
      %c0_9 = arith.constant 0 : index
      %c0_10 = arith.constant 0 : index
      %15 = vector.load %arg8[%c0_9, %c0_10] : memref<8x128xf32, #tpu.memory_space<vmem>>, vector<8x128xf32>
      %c0_i32_11 = arith.constant 0 : i32
      %16 = arith.truncf %15 : vector<8x128xf32> to vector<8x128xbf16>
      %cst = arith.constant dense<0.000000e+00> : vector<8x384xf32>
      %17 = tpu.matmul %16, %12, %cst {dimension_numbers = #tpu.dot_dimension_numbers<[1], [0], [0], [1], [0, 0, 1, 1], [], []>} : vector<8x128xbf16>, vector<128x384xbf16>, vector<8x384xf32> -> vector<8x384xf32>
      %18 = arith.index_cast %c0_i32_11 : i32 to index
      %c0_12 = arith.constant 0 : index
      %c0_13 = arith.constant 0 : index
      %19 = vector.load %arg3[%18, %c0_12, %c0_13] : memref<8x8x384xbf16, #tpu.memory_space<vmem>>, vector<1x8x128xbf16>
      %20 = vector.shape_cast %19 : vector<1x8x128xbf16> to vector<8x128xbf16>
      %21 = arith.extf %20 : vector<8x128xbf16> to vector<8x128xf32>
      %22 = vector.extract_strided_slice %17 {offsets = [0, 0], sizes = [8, 128], strides = [1, 1]} : vector<8x384xf32> to vector<8x128xf32>
      %23 = arith.addf %21, %22 : vector<8x128xf32>
      %24 = arith.negf %23 : vector<8x128xf32>
      %25 = math.exp %24 : vector<8x128xf32>
      %cst_14 = arith.constant 1.000000e+00 : f32
      %26 = vector.broadcast %cst_14 : f32 to vector<8x128xf32>
      %27 = arith.addf %26, %25 : vector<8x128xf32>
      %28 = arith.divf %26, %27 : vector<8x128xf32>
      %29 = arith.index_cast %c0_i32_11 : i32 to index
      %c0_15 = arith.constant 0 : index
      %c128 = arith.constant 128 : index
      %30 = vector.load %arg3[%29, %c0_15, %c128] : memref<8x8x384xbf16, #tpu.memory_space<vmem>>, vector<1x8x128xbf16>
      %31 = vector.shape_cast %30 : vector<1x8x128xbf16> to vector<8x128xbf16>
      %32 = arith.extf %31 : vector<8x128xbf16> to vector<8x128xf32>
      %33 = vector.extract_strided_slice %17 {offsets = [0, 128], sizes = [8, 128], strides = [1, 1]} : vector<8x384xf32> to vector<8x128xf32>
      %34 = arith.addf %32, %33 : vector<8x128xf32>
      %35 = arith.negf %34 : vector<8x128xf32>
      %36 = math.exp %35 : vector<8x128xf32>
      %cst_16 = arith.constant 1.000000e+00 : f32
      %37 = vector.broadcast %cst_16 : f32 to vector<8x128xf32>
      %38 = arith.addf %37, %36 : vector<8x128xf32>
      %39 = arith.divf %37, %38 : vector<8x128xf32>
      %40 = arith.index_cast %c0_i32_11 : i32 to index
      %c0_17 = arith.constant 0 : index
      %c256 = arith.constant 256 : index
      %41 = vector.load %arg3[%40, %c0_17, %c256] : memref<8x8x384xbf16, #tpu.memory_space<vmem>>, vector<1x8x128xbf16>
      %42 = vector.shape_cast %41 : vector<1x8x128xbf16> to vector<8x128xbf16>
      %43 = arith.extf %42 : vector<8x128xbf16> to vector<8x128xf32>
      %44 = vector.extract_strided_slice %17 {offsets = [0, 256], sizes = [8, 128], strides = [1, 1]} : vector<8x384xf32> to vector<8x128xf32>
      %45 = vector.broadcast %13 : vector<1x128xf32> to vector<8x128xf32>
      %46 = arith.addf %44, %45 : vector<8x128xf32>
      %47 = arith.mulf %28, %46 : vector<8x128xf32>
      %48 = arith.addf %43, %47 : vector<8x128xf32>
      %49 = math.tanh %48 : vector<8x128xf32>
      %cst_18 = arith.constant 1.000000e+00 : f32
      %50 = vector.broadcast %cst_18 : f32 to vector<8x128xf32>
      %51 = arith.subf %50, %39 : vector<8x128xf32>
      %52 = arith.mulf %51, %49 : vector<8x128xf32>
      %53 = arith.mulf %39, %15 : vector<8x128xf32>
      %54 = arith.addf %52, %53 : vector<8x128xf32>
      %55 = arith.addi %3, %c0_i32_11 : i32
      %56 = vector.broadcast %55 : i32 to vector<8x1xi32>
      %57 = arith.cmpi slt, %56, %14 : vector<8x1xi32>
      %58 = vector.shape_cast %57 : vector<8x1xi1> to vector<8x1xi1>
      %59 = vector.broadcast %58 : vector<8x1xi1> to vector<8x128xi1>
      %60 = arith.select %59, %54, %15 : vector<8x128xi1>, vector<8x128xf32>
      %c1_i32 = arith.constant 1 : i32
      %61 = arith.truncf %60 : vector<8x128xf32> to vector<8x128xbf16>
      %cst_19 = arith.constant dense<0.000000e+00> : vector<8x384xf32>
      %62 = tpu.matmul %61, %12, %cst_19 {dimension_numbers = #tpu.dot_dimension_numbers<[1], [0], [0], [1], [0, 0, 1, 1], [], []>} : vector<8x128xbf16>, vector<128x384xbf16>, vector<8x384xf32> -> vector<8x384xf32>
      %63 = arith.index_cast %c1_i32 : i32 to index
      %c0_20 = arith.constant 0 : index
      %c0_21 = arith.constant 0 : index
      %64 = vector.load %arg3[%63, %c0_20, %c0_21] : memref<8x8x384xbf16, #tpu.memory_space<vmem>>, vector<1x8x128xbf16>
      %65 = vector.shape_cast %64 : vector<1x8x128xbf16> to vector<8x128xbf16>
      %66 = arith.extf %65 : vector<8x128xbf16> to vector<8x128xf32>
      %67 = vector.extract_strided_slice %62 {offsets = [0, 0], sizes = [8, 128], strides = [1, 1]} : vector<8x384xf32> to vector<8x128xf32>
      %68 = arith.addf %66, %67 : vector<8x128xf32>
      %69 = arith.negf %68 : vector<8x128xf32>
      %70 = math.exp %69 : vector<8x128xf32>
      %cst_22 = arith.constant 1.000000e+00 : f32
      %71 = vector.broadcast %cst_22 : f32 to vector<8x128xf32>
      %72 = arith.addf %71, %70 : vector<8x128xf32>
      %73 = arith.divf %71, %72 : vector<8x128xf32>
      %74 = arith.index_cast %c1_i32 : i32 to index
      %c0_23 = arith.constant 0 : index
      %c128_24 = arith.constant 128 : index
      %75 = vector.load %arg3[%74, %c0_23, %c128_24] : memref<8x8x384xbf16, #tpu.memory_space<vmem>>, vector<1x8x128xbf16>
      %76 = vector.shape_cast %75 : vector<1x8x128xbf16> to vector<8x128xbf16>
      %77 = arith.extf %76 : vector<8x128xbf16> to vector<8x128xf32>
      %78 = vector.extract_strided_slice %62 {offsets = [0, 128], sizes = [8, 128], strides = [1, 1]} : vector<8x384xf32> to vector<8x128xf32>
      %79 = arith.addf %77, %78 : vector<8x128xf32>
      %80 = arith.negf %79 : vector<8x128xf32>
      %81 = math.exp %80 : vector<8x128xf32>
      %cst_25 = arith.constant 1.000000e+00 : f32
      %82 = vector.broadcast %cst_25 : f32 to vector<8x128xf32>
      %83 = arith.addf %82, %81 : vector<8x128xf32>
      %84 = arith.divf %82, %83 : vector<8x128xf32>
      %85 = arith.index_cast %c1_i32 : i32 to index
      %c0_26 = arith.constant 0 : index
      %c256_27 = arith.constant 256 : index
      %86 = vector.load %arg3[%85, %c0_26, %c256_27] : memref<8x8x384xbf16, #tpu.memory_space<vmem>>, vector<1x8x128xbf16>
      %87 = vector.shape_cast %86 : vector<1x8x128xbf16> to vector<8x128xbf16>
      %88 = arith.extf %87 : vector<8x128xbf16> to vector<8x128xf32>
      %89 = vector.extract_strided_slice %62 {offsets = [0, 256], sizes = [8, 128], strides = [1, 1]} : vector<8x384xf32> to vector<8x128xf32>
      %90 = vector.broadcast %13 : vector<1x128xf32> to vector<8x128xf32>
      %91 = arith.addf %89, %90 : vector<8x128xf32>
      %92 = arith.mulf %73, %91 : vector<8x128xf32>
      %93 = arith.addf %88, %92 : vector<8x128xf32>
      %94 = math.tanh %93 : vector<8x128xf32>
      %cst_28 = arith.constant 1.000000e+00 : f32
      %95 = vector.broadcast %cst_28 : f32 to vector<8x128xf32>
      %96 = arith.subf %95, %84 : vector<8x128xf32>
      %97 = arith.mulf %96, %94 : vector<8x128xf32>
      %98 = arith.mulf %84, %60 : vector<8x128xf32>
      %99 = arith.addf %97, %98 : vector<8x128xf32>
      %100 = arith.addi %3, %c1_i32 : i32
      %101 = vector.broadcast %100 : i32 to vector<8x1xi32>
      %102 = arith.cmpi slt, %101, %14 : vector<8x1xi32>
      %103 = vector.shape_cast %102 : vector<8x1xi1> to vector<8x1xi1>
      %104 = vector.broadcast %103 : vector<8x1xi1> to vector<8x128xi1>
      %105 = arith.select %104, %99, %60 : vector<8x128xi1>, vector<8x128xf32>
      %c2_i32 = arith.constant 2 : i32
      %106 = arith.truncf %105 : vector<8x128xf32> to vector<8x128xbf16>
      %cst_29 = arith.constant dense<0.000000e+00> : vector<8x384xf32>
      %107 = tpu.matmul %106, %12, %cst_29 {dimension_numbers = #tpu.dot_dimension_numbers<[1], [0], [0], [1], [0, 0, 1, 1], [], []>} : vector<8x128xbf16>, vector<128x384xbf16>, vector<8x384xf32> -> vector<8x384xf32>
      %108 = arith.index_cast %c2_i32 : i32 to index
      %c0_30 = arith.constant 0 : index
      %c0_31 = arith.constant 0 : index
      %109 = vector.load %arg3[%108, %c0_30, %c0_31] : memref<8x8x384xbf16, #tpu.memory_space<vmem>>, vector<1x8x128xbf16>
      %110 = vector.shape_cast %109 : vector<1x8x128xbf16> to vector<8x128xbf16>
      %111 = arith.extf %110 : vector<8x128xbf16> to vector<8x128xf32>
      %112 = vector.extract_strided_slice %107 {offsets = [0, 0], sizes = [8, 128], strides = [1, 1]} : vector<8x384xf32> to vector<8x128xf32>
      %113 = arith.addf %111, %112 : vector<8x128xf32>
      %114 = arith.negf %113 : vector<8x128xf32>
      %115 = math.exp %114 : vector<8x128xf32>
      %cst_32 = arith.constant 1.000000e+00 : f32
      %116 = vector.broadcast %cst_32 : f32 to vector<8x128xf32>
      %117 = arith.addf %116, %115 : vector<8x128xf32>
      %118 = arith.divf %116, %117 : vector<8x128xf32>
      %119 = arith.index_cast %c2_i32 : i32 to index
      %c0_33 = arith.constant 0 : index
      %c128_34 = arith.constant 128 : index
      %120 = vector.load %arg3[%119, %c0_33, %c128_34] : memref<8x8x384xbf16, #tpu.memory_space<vmem>>, vector<1x8x128xbf16>
      %121 = vector.shape_cast %120 : vector<1x8x128xbf16> to vector<8x128xbf16>
      %122 = arith.extf %121 : vector<8x128xbf16> to vector<8x128xf32>
      %123 = vector.extract_strided_slice %107 {offsets = [0, 128], sizes = [8, 128], strides = [1, 1]} : vector<8x384xf32> to vector<8x128xf32>
      %124 = arith.addf %122, %123 : vector<8x128xf32>
      %125 = arith.negf %124 : vector<8x128xf32>
      %126 = math.exp %125 : vector<8x128xf32>
      %cst_35 = arith.constant 1.000000e+00 : f32
      %127 = vector.broadcast %cst_35 : f32 to vector<8x128xf32>
      %128 = arith.addf %127, %126 : vector<8x128xf32>
      %129 = arith.divf %127, %128 : vector<8x128xf32>
      %130 = arith.index_cast %c2_i32 : i32 to index
      %c0_36 = arith.constant 0 : index
      %c256_37 = arith.constant 256 : index
      %131 = vector.load %arg3[%130, %c0_36, %c256_37] : memref<8x8x384xbf16, #tpu.memory_space<vmem>>, vector<1x8x128xbf16>
      %132 = vector.shape_cast %131 : vector<1x8x128xbf16> to vector<8x128xbf16>
      %133 = arith.extf %132 : vector<8x128xbf16> to vector<8x128xf32>
      %134 = vector.extract_strided_slice %107 {offsets = [0, 256], sizes = [8, 128], strides = [1, 1]} : vector<8x384xf32> to vector<8x128xf32>
      %135 = vector.broadcast %13 : vector<1x128xf32> to vector<8x128xf32>
      %136 = arith.addf %134, %135 : vector<8x128xf32>
      %137 = arith.mulf %118, %136 : vector<8x128xf32>
      %138 = arith.addf %133, %137 : vector<8x128xf32>
      %139 = math.tanh %138 : vector<8x128xf32>
      %cst_38 = arith.constant 1.000000e+00 : f32
      %140 = vector.broadcast %cst_38 : f32 to vector<8x128xf32>
      %141 = arith.subf %140, %129 : vector<8x128xf32>
      %142 = arith.mulf %141, %139 : vector<8x128xf32>
      %143 = arith.mulf %129, %105 : vector<8x128xf32>
      %144 = arith.addf %142, %143 : vector<8x128xf32>
      %145 = arith.addi %3, %c2_i32 : i32
      %146 = vector.broadcast %145 : i32 to vector<8x1xi32>
      %147 = arith.cmpi slt, %146, %14 : vector<8x1xi32>
      %148 = vector.shape_cast %147 : vector<8x1xi1> to vector<8x1xi1>
      %149 = vector.broadcast %148 : vector<8x1xi1> to vector<8x128xi1>
      %150 = arith.select %149, %144, %105 : vector<8x128xi1>, vector<8x128xf32>
      %c3_i32 = arith.constant 3 : i32
      %151 = arith.truncf %150 : vector<8x128xf32> to vector<8x128xbf16>
      %cst_39 = arith.constant dense<0.000000e+00> : vector<8x384xf32>
      %152 = tpu.matmul %151, %12, %cst_39 {dimension_numbers = #tpu.dot_dimension_numbers<[1], [0], [0], [1], [0, 0, 1, 1], [], []>} : vector<8x128xbf16>, vector<128x384xbf16>, vector<8x384xf32> -> vector<8x384xf32>
      %153 = arith.index_cast %c3_i32 : i32 to index
      %c0_40 = arith.constant 0 : index
      %c0_41 = arith.constant 0 : index
      %154 = vector.load %arg3[%153, %c0_40, %c0_41] : memref<8x8x384xbf16, #tpu.memory_space<vmem>>, vector<1x8x128xbf16>
      %155 = vector.shape_cast %154 : vector<1x8x128xbf16> to vector<8x128xbf16>
      %156 = arith.extf %155 : vector<8x128xbf16> to vector<8x128xf32>
      %157 = vector.extract_strided_slice %152 {offsets = [0, 0], sizes = [8, 128], strides = [1, 1]} : vector<8x384xf32> to vector<8x128xf32>
      %158 = arith.addf %156, %157 : vector<8x128xf32>
      %159 = arith.negf %158 : vector<8x128xf32>
      %160 = math.exp %159 : vector<8x128xf32>
      %cst_42 = arith.constant 1.000000e+00 : f32
      %161 = vector.broadcast %cst_42 : f32 to vector<8x128xf32>
      %162 = arith.addf %161, %160 : vector<8x128xf32>
      %163 = arith.divf %161, %162 : vector<8x128xf32>
      %164 = arith.index_cast %c3_i32 : i32 to index
      %c0_43 = arith.constant 0 : index
      %c128_44 = arith.constant 128 : index
      %165 = vector.load %arg3[%164, %c0_43, %c128_44] : memref<8x8x384xbf16, #tpu.memory_space<vmem>>, vector<1x8x128xbf16>
      %166 = vector.shape_cast %165 : vector<1x8x128xbf16> to vector<8x128xbf16>
      %167 = arith.extf %166 : vector<8x128xbf16> to vector<8x128xf32>
      %168 = vector.extract_strided_slice %152 {offsets = [0, 128], sizes = [8, 128], strides = [1, 1]} : vector<8x384xf32> to vector<8x128xf32>
      %169 = arith.addf %167, %168 : vector<8x128xf32>
      %170 = arith.negf %169 : vector<8x128xf32>
      %171 = math.exp %170 : vector<8x128xf32>
      %cst_45 = arith.constant 1.000000e+00 : f32
      %172 = vector.broadcast %cst_45 : f32 to vector<8x128xf32>
      %173 = arith.addf %172, %171 : vector<8x128xf32>
      %174 = arith.divf %172, %173 : vector<8x128xf32>
      %175 = arith.index_cast %c3_i32 : i32 to index
      %c0_46 = arith.constant 0 : index
      %c256_47 = arith.constant 256 : index
      %176 = vector.load %arg3[%175, %c0_46, %c256_47] : memref<8x8x384xbf16, #tpu.memory_space<vmem>>, vector<1x8x128xbf16>
      %177 = vector.shape_cast %176 : vector<1x8x128xbf16> to vector<8x128xbf16>
      %178 = arith.extf %177 : vector<8x128xbf16> to vector<8x128xf32>
      %179 = vector.extract_strided_slice %152 {offsets = [0, 256], sizes = [8, 128], strides = [1, 1]} : vector<8x384xf32> to vector<8x128xf32>
      %180 = vector.broadcast %13 : vector<1x128xf32> to vector<8x128xf32>
      %181 = arith.addf %179, %180 : vector<8x128xf32>
      %182 = arith.mulf %163, %181 : vector<8x128xf32>
      %183 = arith.addf %178, %182 : vector<8x128xf32>
      %184 = math.tanh %183 : vector<8x128xf32>
      %cst_48 = arith.constant 1.000000e+00 : f32
      %185 = vector.broadcast %cst_48 : f32 to vector<8x128xf32>
      %186 = arith.subf %185, %174 : vector<8x128xf32>
      %187 = arith.mulf %186, %184 : vector<8x128xf32>
      %188 = arith.mulf %174, %150 : vector<8x128xf32>
      %189 = arith.addf %187, %188 : vector<8x128xf32>
      %190 = arith.addi %3, %c3_i32 : i32
      %191 = vector.broadcast %190 : i32 to vector<8x1xi32>
      %192 = arith.cmpi slt, %191, %14 : vector<8x1xi32>
      %193 = vector.shape_cast %192 : vector<8x1xi1> to vector<8x1xi1>
      %194 = vector.broadcast %193 : vector<8x1xi1> to vector<8x128xi1>
      %195 = arith.select %194, %189, %150 : vector<8x128xi1>, vector<8x128xf32>
      %c4_i32 = arith.constant 4 : i32
      %196 = arith.truncf %195 : vector<8x128xf32> to vector<8x128xbf16>
      %cst_49 = arith.constant dense<0.000000e+00> : vector<8x384xf32>
      %197 = tpu.matmul %196, %12, %cst_49 {dimension_numbers = #tpu.dot_dimension_numbers<[1], [0], [0], [1], [0, 0, 1, 1], [], []>} : vector<8x128xbf16>, vector<128x384xbf16>, vector<8x384xf32> -> vector<8x384xf32>
      %198 = arith.index_cast %c4_i32 : i32 to index
      %c0_50 = arith.constant 0 : index
      %c0_51 = arith.constant 0 : index
      %199 = vector.load %arg3[%198, %c0_50, %c0_51] : memref<8x8x384xbf16, #tpu.memory_space<vmem>>, vector<1x8x128xbf16>
      %200 = vector.shape_cast %199 : vector<1x8x128xbf16> to vector<8x128xbf16>
      %201 = arith.extf %200 : vector<8x128xbf16> to vector<8x128xf32>
      %202 = vector.extract_strided_slice %197 {offsets = [0, 0], sizes = [8, 128], strides = [1, 1]} : vector<8x384xf32> to vector<8x128xf32>
      %203 = arith.addf %201, %202 : vector<8x128xf32>
      %204 = arith.negf %203 : vector<8x128xf32>
      %205 = math.exp %204 : vector<8x128xf32>
      %cst_52 = arith.constant 1.000000e+00 : f32
      %206 = vector.broadcast %cst_52 : f32 to vector<8x128xf32>
      %207 = arith.addf %206, %205 : vector<8x128xf32>
      %208 = arith.divf %206, %207 : vector<8x128xf32>
      %209 = arith.index_cast %c4_i32 : i32 to index
      %c0_53 = arith.constant 0 : index
      %c128_54 = arith.constant 128 : index
      %210 = vector.load %arg3[%209, %c0_53, %c128_54] : memref<8x8x384xbf16, #tpu.memory_space<vmem>>, vector<1x8x128xbf16>
      %211 = vector.shape_cast %210 : vector<1x8x128xbf16> to vector<8x128xbf16>
      %212 = arith.extf %211 : vector<8x128xbf16> to vector<8x128xf32>
      %213 = vector.extract_strided_slice %197 {offsets = [0, 128], sizes = [8, 128], strides = [1, 1]} : vector<8x384xf32> to vector<8x128xf32>
      %214 = arith.addf %212, %213 : vector<8x128xf32>
      %215 = arith.negf %214 : vector<8x128xf32>
      %216 = math.exp %215 : vector<8x128xf32>
      %cst_55 = arith.constant 1.000000e+00 : f32
      %217 = vector.broadcast %cst_55 : f32 to vector<8x128xf32>
      %218 = arith.addf %217, %216 : vector<8x128xf32>
      %219 = arith.divf %217, %218 : vector<8x128xf32>
      %220 = arith.index_cast %c4_i32 : i32 to index
      %c0_56 = arith.constant 0 : index
      %c256_57 = arith.constant 256 : index
      %221 = vector.load %arg3[%220, %c0_56, %c256_57] : memref<8x8x384xbf16, #tpu.memory_space<vmem>>, vector<1x8x128xbf16>
      %222 = vector.shape_cast %221 : vector<1x8x128xbf16> to vector<8x128xbf16>
      %223 = arith.extf %222 : vector<8x128xbf16> to vector<8x128xf32>
      %224 = vector.extract_strided_slice %197 {offsets = [0, 256], sizes = [8, 128], strides = [1, 1]} : vector<8x384xf32> to vector<8x128xf32>
      %225 = vector.broadcast %13 : vector<1x128xf32> to vector<8x128xf32>
      %226 = arith.addf %224, %225 : vector<8x128xf32>
      %227 = arith.mulf %208, %226 : vector<8x128xf32>
      %228 = arith.addf %223, %227 : vector<8x128xf32>
      %229 = math.tanh %228 : vector<8x128xf32>
      %cst_58 = arith.constant 1.000000e+00 : f32
      %230 = vector.broadcast %cst_58 : f32 to vector<8x128xf32>
      %231 = arith.subf %230, %219 : vector<8x128xf32>
      %232 = arith.mulf %231, %229 : vector<8x128xf32>
      %233 = arith.mulf %219, %195 : vector<8x128xf32>
      %234 = arith.addf %232, %233 : vector<8x128xf32>
      %235 = arith.addi %3, %c4_i32 : i32
      %236 = vector.broadcast %235 : i32 to vector<8x1xi32>
      %237 = arith.cmpi slt, %236, %14 : vector<8x1xi32>
      %238 = vector.shape_cast %237 : vector<8x1xi1> to vector<8x1xi1>
      %239 = vector.broadcast %238 : vector<8x1xi1> to vector<8x128xi1>
      %240 = arith.select %239, %234, %195 : vector<8x128xi1>, vector<8x128xf32>
      %c5_i32 = arith.constant 5 : i32
      %241 = arith.truncf %240 : vector<8x128xf32> to vector<8x128xbf16>
      %cst_59 = arith.constant dense<0.000000e+00> : vector<8x384xf32>
      %242 = tpu.matmul %241, %12, %cst_59 {dimension_numbers = #tpu.dot_dimension_numbers<[1], [0], [0], [1], [0, 0, 1, 1], [], []>} : vector<8x128xbf16>, vector<128x384xbf16>, vector<8x384xf32> -> vector<8x384xf32>
      %243 = arith.index_cast %c5_i32 : i32 to index
      %c0_60 = arith.constant 0 : index
      %c0_61 = arith.constant 0 : index
      %244 = vector.load %arg3[%243, %c0_60, %c0_61] : memref<8x8x384xbf16, #tpu.memory_space<vmem>>, vector<1x8x128xbf16>
      %245 = vector.shape_cast %244 : vector<1x8x128xbf16> to vector<8x128xbf16>
      %246 = arith.extf %245 : vector<8x128xbf16> to vector<8x128xf32>
      %247 = vector.extract_strided_slice %242 {offsets = [0, 0], sizes = [8, 128], strides = [1, 1]} : vector<8x384xf32> to vector<8x128xf32>
      %248 = arith.addf %246, %247 : vector<8x128xf32>
      %249 = arith.negf %248 : vector<8x128xf32>
      %250 = math.exp %249 : vector<8x128xf32>
      %cst_62 = arith.constant 1.000000e+00 : f32
      %251 = vector.broadcast %cst_62 : f32 to vector<8x128xf32>
      %252 = arith.addf %251, %250 : vector<8x128xf32>
      %253 = arith.divf %251, %252 : vector<8x128xf32>
      %254 = arith.index_cast %c5_i32 : i32 to index
      %c0_63 = arith.constant 0 : index
      %c128_64 = arith.constant 128 : index
      %255 = vector.load %arg3[%254, %c0_63, %c128_64] : memref<8x8x384xbf16, #tpu.memory_space<vmem>>, vector<1x8x128xbf16>
      %256 = vector.shape_cast %255 : vector<1x8x128xbf16> to vector<8x128xbf16>
      %257 = arith.extf %256 : vector<8x128xbf16> to vector<8x128xf32>
      %258 = vector.extract_strided_slice %242 {offsets = [0, 128], sizes = [8, 128], strides = [1, 1]} : vector<8x384xf32> to vector<8x128xf32>
      %259 = arith.addf %257, %258 : vector<8x128xf32>
      %260 = arith.negf %259 : vector<8x128xf32>
      %261 = math.exp %260 : vector<8x128xf32>
      %cst_65 = arith.constant 1.000000e+00 : f32
      %262 = vector.broadcast %cst_65 : f32 to vector<8x128xf32>
      %263 = arith.addf %262, %261 : vector<8x128xf32>
      %264 = arith.divf %262, %263 : vector<8x128xf32>
      %265 = arith.index_cast %c5_i32 : i32 to index
      %c0_66 = arith.constant 0 : index
      %c256_67 = arith.constant 256 : index
      %266 = vector.load %arg3[%265, %c0_66, %c256_67] : memref<8x8x384xbf16, #tpu.memory_space<vmem>>, vector<1x8x128xbf16>
      %267 = vector.shape_cast %266 : vector<1x8x128xbf16> to vector<8x128xbf16>
      %268 = arith.extf %267 : vector<8x128xbf16> to vector<8x128xf32>
      %269 = vector.extract_strided_slice %242 {offsets = [0, 256], sizes = [8, 128], strides = [1, 1]} : vector<8x384xf32> to vector<8x128xf32>
      %270 = vector.broadcast %13 : vector<1x128xf32> to vector<8x128xf32>
      %271 = arith.addf %269, %270 : vector<8x128xf32>
      %272 = arith.mulf %253, %271 : vector<8x128xf32>
      %273 = arith.addf %268, %272 : vector<8x128xf32>
      %274 = math.tanh %273 : vector<8x128xf32>
      %cst_68 = arith.constant 1.000000e+00 : f32
      %275 = vector.broadcast %cst_68 : f32 to vector<8x128xf32>
      %276 = arith.subf %275, %264 : vector<8x128xf32>
      %277 = arith.mulf %276, %274 : vector<8x128xf32>
      %278 = arith.mulf %264, %240 : vector<8x128xf32>
      %279 = arith.addf %277, %278 : vector<8x128xf32>
      %280 = arith.addi %3, %c5_i32 : i32
      %281 = vector.broadcast %280 : i32 to vector<8x1xi32>
      %282 = arith.cmpi slt, %281, %14 : vector<8x1xi32>
      %283 = vector.shape_cast %282 : vector<8x1xi1> to vector<8x1xi1>
      %284 = vector.broadcast %283 : vector<8x1xi1> to vector<8x128xi1>
      %285 = arith.select %284, %279, %240 : vector<8x128xi1>, vector<8x128xf32>
      %c6_i32 = arith.constant 6 : i32
      %286 = arith.truncf %285 : vector<8x128xf32> to vector<8x128xbf16>
      %cst_69 = arith.constant dense<0.000000e+00> : vector<8x384xf32>
      %287 = tpu.matmul %286, %12, %cst_69 {dimension_numbers = #tpu.dot_dimension_numbers<[1], [0], [0], [1], [0, 0, 1, 1], [], []>} : vector<8x128xbf16>, vector<128x384xbf16>, vector<8x384xf32> -> vector<8x384xf32>
      %288 = arith.index_cast %c6_i32 : i32 to index
      %c0_70 = arith.constant 0 : index
      %c0_71 = arith.constant 0 : index
      %289 = vector.load %arg3[%288, %c0_70, %c0_71] : memref<8x8x384xbf16, #tpu.memory_space<vmem>>, vector<1x8x128xbf16>
      %290 = vector.shape_cast %289 : vector<1x8x128xbf16> to vector<8x128xbf16>
      %291 = arith.extf %290 : vector<8x128xbf16> to vector<8x128xf32>
      %292 = vector.extract_strided_slice %287 {offsets = [0, 0], sizes = [8, 128], strides = [1, 1]} : vector<8x384xf32> to vector<8x128xf32>
      %293 = arith.addf %291, %292 : vector<8x128xf32>
      %294 = arith.negf %293 : vector<8x128xf32>
      %295 = math.exp %294 : vector<8x128xf32>
      %cst_72 = arith.constant 1.000000e+00 : f32
      %296 = vector.broadcast %cst_72 : f32 to vector<8x128xf32>
      %297 = arith.addf %296, %295 : vector<8x128xf32>
      %298 = arith.divf %296, %297 : vector<8x128xf32>
      %299 = arith.index_cast %c6_i32 : i32 to index
      %c0_73 = arith.constant 0 : index
      %c128_74 = arith.constant 128 : index
      %300 = vector.load %arg3[%299, %c0_73, %c128_74] : memref<8x8x384xbf16, #tpu.memory_space<vmem>>, vector<1x8x128xbf16>
      %301 = vector.shape_cast %300 : vector<1x8x128xbf16> to vector<8x128xbf16>
      %302 = arith.extf %301 : vector<8x128xbf16> to vector<8x128xf32>
      %303 = vector.extract_strided_slice %287 {offsets = [0, 128], sizes = [8, 128], strides = [1, 1]} : vector<8x384xf32> to vector<8x128xf32>
      %304 = arith.addf %302, %303 : vector<8x128xf32>
      %305 = arith.negf %304 : vector<8x128xf32>
      %306 = math.exp %305 : vector<8x128xf32>
      %cst_75 = arith.constant 1.000000e+00 : f32
      %307 = vector.broadcast %cst_75 : f32 to vector<8x128xf32>
      %308 = arith.addf %307, %306 : vector<8x128xf32>
      %309 = arith.divf %307, %308 : vector<8x128xf32>
      %310 = arith.index_cast %c6_i32 : i32 to index
      %c0_76 = arith.constant 0 : index
      %c256_77 = arith.constant 256 : index
      %311 = vector.load %arg3[%310, %c0_76, %c256_77] : memref<8x8x384xbf16, #tpu.memory_space<vmem>>, vector<1x8x128xbf16>
      %312 = vector.shape_cast %311 : vector<1x8x128xbf16> to vector<8x128xbf16>
      %313 = arith.extf %312 : vector<8x128xbf16> to vector<8x128xf32>
      %314 = vector.extract_strided_slice %287 {offsets = [0, 256], sizes = [8, 128], strides = [1, 1]} : vector<8x384xf32> to vector<8x128xf32>
      %315 = vector.broadcast %13 : vector<1x128xf32> to vector<8x128xf32>
      %316 = arith.addf %314, %315 : vector<8x128xf32>
      %317 = arith.mulf %298, %316 : vector<8x128xf32>
      %318 = arith.addf %313, %317 : vector<8x128xf32>
      %319 = math.tanh %318 : vector<8x128xf32>
      %cst_78 = arith.constant 1.000000e+00 : f32
      %320 = vector.broadcast %cst_78 : f32 to vector<8x128xf32>
      %321 = arith.subf %320, %309 : vector<8x128xf32>
      %322 = arith.mulf %321, %319 : vector<8x128xf32>
      %323 = arith.mulf %309, %285 : vector<8x128xf32>
      %324 = arith.addf %322, %323 : vector<8x128xf32>
      %325 = arith.addi %3, %c6_i32 : i32
      %326 = vector.broadcast %325 : i32 to vector<8x1xi32>
      %327 = arith.cmpi slt, %326, %14 : vector<8x1xi32>
      %328 = vector.shape_cast %327 : vector<8x1xi1> to vector<8x1xi1>
      %329 = vector.broadcast %328 : vector<8x1xi1> to vector<8x128xi1>
      %330 = arith.select %329, %324, %285 : vector<8x128xi1>, vector<8x128xf32>
      %c7_i32 = arith.constant 7 : i32
      %331 = arith.truncf %330 : vector<8x128xf32> to vector<8x128xbf16>
      %cst_79 = arith.constant dense<0.000000e+00> : vector<8x384xf32>
      %332 = tpu.matmul %331, %12, %cst_79 {dimension_numbers = #tpu.dot_dimension_numbers<[1], [0], [0], [1], [0, 0, 1, 1], [], []>} : vector<8x128xbf16>, vector<128x384xbf16>, vector<8x384xf32> -> vector<8x384xf32>
      %333 = arith.index_cast %c7_i32 : i32 to index
      %c0_80 = arith.constant 0 : index
      %c0_81 = arith.constant 0 : index
      %334 = vector.load %arg3[%333, %c0_80, %c0_81] : memref<8x8x384xbf16, #tpu.memory_space<vmem>>, vector<1x8x128xbf16>
      %335 = vector.shape_cast %334 : vector<1x8x128xbf16> to vector<8x128xbf16>
      %336 = arith.extf %335 : vector<8x128xbf16> to vector<8x128xf32>
      %337 = vector.extract_strided_slice %332 {offsets = [0, 0], sizes = [8, 128], strides = [1, 1]} : vector<8x384xf32> to vector<8x128xf32>
      %338 = arith.addf %336, %337 : vector<8x128xf32>
      %339 = arith.negf %338 : vector<8x128xf32>
      %340 = math.exp %339 : vector<8x128xf32>
      %cst_82 = arith.constant 1.000000e+00 : f32
      %341 = vector.broadcast %cst_82 : f32 to vector<8x128xf32>
      %342 = arith.addf %341, %340 : vector<8x128xf32>
      %343 = arith.divf %341, %342 : vector<8x128xf32>
      %344 = arith.index_cast %c7_i32 : i32 to index
      %c0_83 = arith.constant 0 : index
      %c128_84 = arith.constant 128 : index
      %345 = vector.load %arg3[%344, %c0_83, %c128_84] : memref<8x8x384xbf16, #tpu.memory_space<vmem>>, vector<1x8x128xbf16>
      %346 = vector.shape_cast %345 : vector<1x8x128xbf16> to vector<8x128xbf16>
      %347 = arith.extf %346 : vector<8x128xbf16> to vector<8x128xf32>
      %348 = vector.extract_strided_slice %332 {offsets = [0, 128], sizes = [8, 128], strides = [1, 1]} : vector<8x384xf32> to vector<8x128xf32>
      %349 = arith.addf %347, %348 : vector<8x128xf32>
      %350 = arith.negf %349 : vector<8x128xf32>
      %351 = math.exp %350 : vector<8x128xf32>
      %cst_85 = arith.constant 1.000000e+00 : f32
      %352 = vector.broadcast %cst_85 : f32 to vector<8x128xf32>
      %353 = arith.addf %352, %351 : vector<8x128xf32>
      %354 = arith.divf %352, %353 : vector<8x128xf32>
      %355 = arith.index_cast %c7_i32 : i32 to index
      %c0_86 = arith.constant 0 : index
      %c256_87 = arith.constant 256 : index
      %356 = vector.load %arg3[%355, %c0_86, %c256_87] : memref<8x8x384xbf16, #tpu.memory_space<vmem>>, vector<1x8x128xbf16>
      %357 = vector.shape_cast %356 : vector<1x8x128xbf16> to vector<8x128xbf16>
      %358 = arith.extf %357 : vector<8x128xbf16> to vector<8x128xf32>
      %359 = vector.extract_strided_slice %332 {offsets = [0, 256], sizes = [8, 128], strides = [1, 1]} : vector<8x384xf32> to vector<8x128xf32>
      %360 = vector.broadcast %13 : vector<1x128xf32> to vector<8x128xf32>
      %361 = arith.addf %359, %360 : vector<8x128xf32>
      %362 = arith.mulf %343, %361 : vector<8x128xf32>
      %363 = arith.addf %358, %362 : vector<8x128xf32>
      %364 = math.tanh %363 : vector<8x128xf32>
      %cst_88 = arith.constant 1.000000e+00 : f32
      %365 = vector.broadcast %cst_88 : f32 to vector<8x128xf32>
      %366 = arith.subf %365, %354 : vector<8x128xf32>
      %367 = arith.mulf %366, %364 : vector<8x128xf32>
      %368 = arith.mulf %354, %330 : vector<8x128xf32>
      %369 = arith.addf %367, %368 : vector<8x128xf32>
      %370 = arith.addi %3, %c7_i32 : i32
      %371 = vector.broadcast %370 : i32 to vector<8x1xi32>
      %372 = arith.cmpi slt, %371, %14 : vector<8x1xi32>
      %373 = vector.shape_cast %372 : vector<8x1xi1> to vector<8x1xi1>
      %374 = vector.broadcast %373 : vector<8x1xi1> to vector<8x128xi1>
      %375 = arith.select %374, %369, %330 : vector<8x128xi1>, vector<8x128xf32>
      %c8_i32_89 = arith.constant 8 : i32
      %c0_90 = arith.constant 0 : index
      %c0_91 = arith.constant 0 : index
      %376 = vector.load %arg8[%c0_90, %c0_91] : memref<8x128xf32, #tpu.memory_space<vmem>>, vector<8x128xf32>
      tpu.vector_store %arg8[%c0_90, %c0_91], %375 {strides = array<i32>} : memref<8x128xf32, #tpu.memory_space<vmem>>, vector<8x128xf32>,
    } else {
    }
    %c0_i32_2 = arith.constant 0 : i32
    %9 = arith.cmpi eq, %arg1, %c0_i32_2 : i32
    %10 = arith.extui %9 : i1 to i32
    %c0_i32_3 = arith.constant 0 : i32
    %11 = arith.cmpi ne, %10, %c0_i32_3 : i32
    scf.if %11 {
      %c0 = arith.constant 0 : index
      %c0_4 = arith.constant 0 : index
      %12 = vector.load %arg8[%c0, %c0_4] : memref<8x128xf32, #tpu.memory_space<vmem>>, vector<8x128xf32>
      %13 = arith.negf %12 : vector<8x128xf32>
      %14 = math.exp %13 : vector<8x128xf32>
      %cst = arith.constant 1.000000e+00 : f32
      %15 = vector.broadcast %cst : f32 to vector<8x128xf32>
      %16 = arith.addf %15, %14 : vector<8x128xf32>
      %17 = arith.divf %15, %16 : vector<8x128xf32>
      %c0_5 = arith.constant 0 : index
      %c0_6 = arith.constant 0 : index
      %18 = vector.load %arg7[%c0_5, %c0_6] : memref<8x128xf32, #tpu.memory_space<vmem>>, vector<8x128xf32>
      tpu.vector_store %arg7[%c0_5, %c0_6], %17 {strides = array<i32>} : memref<8x128xf32, #tpu.memory_space<vmem>>, vector<8x128xf32>,
    } else {
    }
    return
  }
  func.func @transform_0(%arg0: i32, %arg1: i32, %arg2: memref<1xi32, #tpu.memory_space<smem>>) -> (i32, i32, i32) {
    %c0_i32 = arith.constant 0 : i32
    %c0_i32_0 = arith.constant 0 : i32
    return %arg1, %arg0, %c0_i32 : i32, i32, i32
  }
  func.func @transform_1(%arg0: i32, %arg1: i32, %arg2: memref<1xi32, #tpu.memory_space<smem>>) -> (i32, i32) {
    %c0_i32 = arith.constant 0 : i32
    %c0_i32_0 = arith.constant 0 : i32
    return %arg0, %c0_i32 : i32, i32
  }
  func.func @transform_2(%arg0: i32, %arg1: i32, %arg2: memref<1xi32, #tpu.memory_space<smem>>) -> (i32, i32) {
    %c0_i32 = arith.constant 0 : i32
    %c0_i32_0 = arith.constant 0 : i32
    %c0_i32_1 = arith.constant 0 : i32
    return %c0_i32, %c0_i32_0 : i32, i32
  }
  func.func @transform_3(%arg0: i32, %arg1: i32, %arg2: memref<1xi32, #tpu.memory_space<smem>>) -> (i32, i32) {
    %c0_i32 = arith.constant 0 : i32
    %c0_i32_0 = arith.constant 0 : i32
    %c0_i32_1 = arith.constant 0 : i32
    return %c0_i32, %c0_i32_0 : i32, i32
  }
  func.func @transform_4(%arg0: i32, %arg1: i32, %arg2: memref<1xi32, #tpu.memory_space<smem>>) -> (i32, i32) {
    %c0_i32 = arith.constant 0 : i32
    %c0_i32_0 = arith.constant 0 : i32
    return %arg0, %c0_i32 : i32, i32
  }
}

</mosaic_0001>

<bundles_post_ra>
// kernel: tpu_custom_call.1
= control target key start
LH: loop header
LB: loop body
LE: loop exit
PB: predicated region body
PF: predicated region fallthrough
CT: control target
= control target key end

     0   :  { %11 = vsyncpa [#allocation6], 0  ;;  %s2202_s0 = inlined_call_operand.<no memory space> [shape: s32[1], index: 0, kind: input, shape index: {}]   ;;  %s2203_s1 = inlined_call_operand.hbm [shape: bf16[8,8,384], index: 1, kind: input, shape index: {}]   ;;  %s2204_s2 = inlined_call_operand.vmem [shape: s32[8,1], index: 2, kind: input, shape index: {}]   ;;  %s2205_s3 = inlined_call_operand.hbm [shape: bf16[128,384], index: 3, kind: input, shape index: {}]   ;;  %s2206_s4 = inlined_call_operand.vmem [shape: f32[1,128], index: 4, kind: input, shape index: {}]   ;;  %s2207_s5 = inlined_call_operand.hbm [shape: f32[8,128], index: 5, kind: output, shape index: {}]  }
   0x1   :  { %12 = vsyncpa [#allocation9], 0 }
   0x2   :  { %13 = vsyncpa [#allocation7], 0  ;;  %s1719_s18 = smov [#allocation5]   ;;  %s1647_s22 = scalar_lea.hbm %s2203_s1, 1536 }
   0x3   :  { %s19_s19 = sshll.u32 %s1719_s18, 4  ;;  %p1648_p0 = scmp.ne.s32.totalorder %s2203_s1, %s1647_s22  ;;  %s20_s19 = int_to_ptr.vmem [resolvable:$true] %s19_s19 }
   0x4   :  { %p1651_p1 = scmp.lt.u32.totalorder %s1647_s22, %s2203_s1 }
   0x6   :  { %p1653_p2 = pnand %p1651_p1, %p1648_p0 }
   0x8   :  { %1656 = shalt.err (!%p1653_p2)
}
   0x9   :  { %s1657_s27 = scalar_lea.vmem %s20_s19, 1536  ;;  %p1662_p4 = scmp.lt.s32.totalorder %s20_s19, %s20_s19 }
   0xa   :  { %p1658_p3 = scmp.ne.s32.totalorder %s20_s19, %s1657_s27  ;;  %p1663_p5 = scmp.lt.s32.totalorder %s1657_s27, %s1657_s27 }
   0xc   :  { %p1664_p6 = por %p1663_p5, %p1662_p4 }
   0xe   :  { %p1665_p7 = pnand %p1664_p6, %p1658_p3 }
  0x10   :  { %1668 = shalt.err (!%p1665_p7)
}
  0x11   :  { %s1720_s28 = smov 192   ;;  %s1721_s29 = smov 12  }
  0x12   :  { %25 = dma.hbm_to_vmem [thread:$0]  %s2203_s1, 1536, %s20_s19, [#allocation6], %s1720_s28, %s1720_s28, %s1721_s29  }
  0x13   :  { %s1722_s7 = smov [#allocation8]   ;;  %s1669_s11 = scalar_lea.hbm %s2205_s3, 3072 }
  0x14   :  { %s33_s8 = sshll.u32 %s1722_s7, 4  ;;  %p1670_p8 = scmp.ne.s32.totalorder %s2205_s3, %s1669_s11  ;;  %s34_s8 = int_to_ptr.vmem [resolvable:$true] %s33_s8 }
  0x15   :  { %p1673_p9 = scmp.lt.u32.totalorder %s1669_s11, %s2205_s3 }
  0x17   :  { %p1675_p10 = pnand %p1673_p9, %p1670_p8 }
  0x19   :  { %1678 = shalt.err (!%p1675_p10)
}
  0x1a   :  { %s1679_s16 = scalar_lea.vmem %s34_s8, 3072  ;;  %p1684_p12 = scmp.lt.s32.totalorder %s34_s8, %s34_s8 }
  0x1b   :  { %p1680_p11 = scmp.ne.s32.totalorder %s34_s8, %s1679_s16  ;;  %p1685_p13 = scmp.lt.s32.totalorder %s1679_s16, %s1679_s16 }
  0x1d   :  { %p1686_p0 = por %p1685_p13, %p1684_p12 }
  0x1f   :  { %p1687_p1 = pnand %p1686_p0, %p1680_p11 }
  0x21   :  { %1690 = shalt.err (!%p1687_p1)
}
  0x22   :  { %39 = dma.hbm_to_vmem [thread:$0]  %s2205_s3, 3072, %s34_s8, [#allocation9], %s1720_s28, %s1720_s28, %s1721_s29  }
  0x23   :  { %1713 = dma.done.wait [#allocation6], 1536  }
  0x24   :  { %1714 = vsyncadd [#allocation6], 4294965760 }
  0x25   :  { %1715 = dma.done.wait [#allocation9], 3072  }
  0x26   :  { %1716 = vsyncadd [#allocation9], 4294964224  ;;  %v1723_v0 = vmov 0.0   ;;  %p1216_p2 = scmp.le.s32.totalorder %s2202_s0, 0 }
  0x27   :  { %53 = vst [vmem:[#allocation2] sm:$0xff] %v1723_v0  ;;  %v1785_v1 = vld [vmem:[#allocation8 + $0x4] ss:$12 sps:$4 sm:$0xff] (!%p1216_p2)   ;;  %v1787_v2 = vld [vmem:[#allocation8] ss:$12 sps:$4 sm:$0xff] (!%p1216_p2)   ;;  %v1724_v3 = vmov (!%p1216_p2), 0.0  }
  0x28   :  { %59 = sbr.rel (%p1216_p2) target bundleno = 2168 (0x878), region = 33  ;;  %1339 = vmatprep.subr.bf16.mxu1 (!%p1216_p2), %v1724_v3  ;;  %v1725_v4 = vmov (!%p1216_p2), 0   ;;  %224 = vmatprep.subr.bf16.mxu0 (!%p1216_p2), %v1785_v1  ;;  %v1792_v5 = vld [vmem:[#allocation8 + $0x1c] ss:$12 sps:$4 sm:$0xff] (!%p1216_p2)   ;;  %vm1726_vm0 = vmmov (!%p1216_p2), 0   ;;  %v305_v34 = vld [vmem:[#allocation5] sm:$0xff] (!%p1216_p2)  }
  0x29   :  { %256 = vmatprep.mubr.bf16.mxu0 (!%p1216_p2), %v1725_v4  ;;  %1355 = vmatprep.mubr.msk.bf16.mxu1 (!%p1216_p2), %vm1726_vm0, %v1724_v3  ;;  %v1797_v6 = vld [vmem:[#allocation8 + $0x18] ss:$12 sps:$4 sm:$0xff] (!%p1216_p2)   ;;  %v1801_v7 = vld [vmem:[#allocation8 + $0x34] ss:$12 sps:$4 sm:$0xff] (!%p1216_p2)   ;;  %v1805_v8 = vld [vmem:[#allocation8 + $0x30] ss:$12 sps:$4 sm:$0xff] (!%p1216_p2)   ;;  %v306_v35 = vunpack.c.l.bf16 (!%p1216_p2), %v305_v34  ;;  %v315_v37 = vunpack.c.h.bf16 (!%p1216_p2), %v305_v34 }
  0x2a   :  { %225 = vmatpush1.bf16.msra.mxu0 (!%p1216_p2), %v1787_v2  ;;  %1508 = vset.pattern.permute.xlu0 (!%p1216_p2), %v1725_v4  ;;  %v1808_v9 = vld [vmem:[#allocation8 + $0x4c] ss:$12 sps:$4 sm:$0xff] (!%p1216_p2)   ;;  %v1810_v10 = vld [vmem:[#allocation8 + $0x8] ss:$12 sps:$4 sm:$0xff] (!%p1216_p2)   ;;  %v1817_v12 = vld [vmem:[#allocation8 + $0x64] ss:$12 sps:$4 sm:$0xff] (!%p1216_p2)  }
  0x2b   :  { %226 = vmatprep.subr.bf16.mxu0 (!%p1216_p2), %v1792_v5  ;;  %1509 = vset.pattern.permute.xlu1 (!%p1216_p2), %v1725_v4  ;;  %v1813_v11 = vld [vmem:[#allocation8 + $0x48] ss:$12 sps:$4 sm:$0xff] (!%p1216_p2)   ;;  %v1820_v13 = vld [vmem:[#allocation8 + $0x20] ss:$12 sps:$4 sm:$0xff] (!%p1216_p2)   ;;  %v1826_v15 = vld [vmem:[#allocation8 + $0x38] ss:$12 sps:$4 sm:$0xff] (!%p1216_p2)  }
  0x2c   :  { %1340 = vmatpush3.bf16.msra.mxu1 (!%p1216_p2), %v1810_v10  ;;  %v1822_v14 = vld [vmem:[#allocation8 + $0x60] ss:$12 sps:$4 sm:$0xff] (!%p1216_p2)   ;;  %v1829_v16 = vld [vmem:[#allocation8 + $0x7c] ss:$12 sps:$4 sm:$0xff] (!%p1216_p2)   ;;  %v1833_v17 = vld [vmem:[#allocation8 + $0x78] ss:$12 sps:$4 sm:$0xff] (!%p1216_p2)  }
  0x2d   :  { %1341 = vmatprep.subr.bf16.mxu1 (!%p1216_p2), %v1724_v3  ;;  %v1836_v18 = vld [vmem:[#allocation8 + $0x50] ss:$12 sps:$4 sm:$0xff] (!%p1216_p2)   ;;  %v1844_v20 = vld [vmem:[#allocation8 + $0x94] ss:$12 sps:$4 sm:$0xff] (!%p1216_p2)   ;;  %v1858_v25 = vld [vmem:[#allocation8 + $0xac] ss:$12 sps:$4 sm:$0xff] (!%p1216_p2)  }
  0x2e   :  { %227 = vmatpush1.bf16.msra.mxu0 (!%p1216_p2), %v1797_v6  ;;  %v1841_v19 = vld [vmem:[%s2204_s2] sm:$0xff] (!%p1216_p2)  ;;  %v1854_v23 = vld [vmem:[#allocation8 + $0x68] ss:$12 sps:$4 sm:$0xff] (!%p1216_p2)   ;;  %v1868_v28 = vld [vmem:[#allocation8 + $0x80] ss:$12 sps:$4 sm:$0xff] (!%p1216_p2)  }
  0x2f   :  { %228 = vmatprep.subr.bf16.mxu0 %v1801_v7  ;;  %vm1244_vm1 = vcmp.gt.s32.totalorder %v1841_v19, 0  ;;  %vm1247_vm2 = vcmp.gt.s32.totalorder %v1841_v19, 1  ;;  %v1851_v22 = vld [vmem:[#allocation8 + $0x90] ss:$12 sps:$4 sm:$0xff]   ;;  %vm1256_vm3 = vcmp.gt.s32.totalorder %v1841_v19, 4  ;;  %vm1262_vm4 = vcmp.gt.s32.totalorder %v1841_v19, 6 }
  0x30   :  { %1342 = vmatpush3.bf16.msra.mxu1 %v1820_v13  ;;  %v341_v21 = vsel %vm1244_vm1, 1, %v1725_v4  ;;  %v461_v24 = vsel %vm1247_vm2, 1, %v1725_v4  ;;  %v1863_v26 = vld [vmem:[#allocation8 + $0xa8] ss:$12 sps:$4 sm:$0xff]   ;;  %v1865_v27 = vld [vmem:[#allocation2] sm:$0xff]  ;;  %v821_v29 = vsel %vm1256_vm3, 1, %v1725_v4 }
  0x31   :  { %1343 = vmatprep.subr.bf16.mxu1 %v1724_v3  ;;  %343 = vperm.xlu0 %1508, %v341_v21   ;;  %v95_v30 = vpack.c.bf16 %v1865_v27, %v1865_v27  ;;  %v1878_v31 = vld [vmem:[#allocation8 + $0x98] ss:$12 sps:$4 sm:$0xff]   ;;  %v1061_v32 = vsel %vm1262_vm4, 1, %v1725_v4  ;;  %v1884_v33 = vld [vmem:[#allocation8 + $0xb0] ss:$12 sps:$4 sm:$0xff]   ;;  %v1929_v53 = vld [vmem:[#allocation5 + $0x8] sm:$0xff]  }
  0x32   :  { %229 = vmatpush1.bf16.msra.mxu0 %v1805_v8  ;;  %v1927_v52 = vld [vmem:[%s2206_s4] ss:$0 sm:$0xff]  ;;  %v324_v56 = vunpack.c.l.bf16 %v1929_v53  ;;  %vm1250_vm6 = vcmp.gt.s32.totalorder %v1841_v19, 2  ;;  %vm1253_vm7 = vcmp.gt.s32.totalorder %v1841_v19, 3  ;;  %vm1259_vm8 = vcmp.gt.s32.totalorder %v1841_v19, 5 }
  0x33   :  { %230 = vmatprep.subr.bf16.mxu0 %v1808_v9  ;;  %v941_v34 = vsel %vm1259_vm8, 1, %v1725_v4  ;;  %vm1265_vm9 = vcmp.gt.s32.totalorder %v1841_v19, 7 }
  0x34   :  { %1344 = vmatpush3.bf16.msra.mxu1 %v1826_v15 }
  0x35   :  { %1345 = vmatprep.subr.bf16.mxu1 %v1724_v3  ;;  %463 = vperm.xlu0 %1508, %v461_v24  }
  0x36   :  { %231 = vmatpush1.bf16.msra.mxu0 %v1813_v11 }
  0x37   :  { %232 = vmatprep.subr.bf16.mxu0 %v1817_v12 }
  0x38   :  { %1346 = vmatpush3.bf16.msra.mxu1 %v1836_v18 }
  0x39   :  { %1347 = vmatprep.subr.bf16.mxu1 %v1724_v3  ;;  %823 = vperm.xlu0 %1508, %v821_v29  }
  0x3a   :  { %233 = vmatpush1.bf16.msra.mxu0 %v1822_v14 }
  0x3b   :  { %234 = vmatprep.subr.bf16.mxu0 %v1829_v16 }
  0x3c   :  { %1348 = vmatpush3.bf16.msra.mxu1 %v1854_v23 }
  0x3d   :  { %1349 = vmatprep.subr.bf16.mxu1 %v1724_v3  ;;  %1063 = vperm.xlu0 %1508, %v1061_v32   ;;  %v701_v32 = vsel %vm1253_vm7, 1, %v1725_v4 }
  0x3e   :  { %235 = vmatpush1.bf16.msra.mxu0 %v1833_v17 }
  0x3f   :  { %236 = vmatprep.subr.bf16.mxu0 %v1844_v20 }
  0x40   :  { %1350 = vmatpush3.bf16.msra.mxu1 %v1868_v28 }
  0x41   :  { %1351 = vmatprep.subr.bf16.mxu1 %v1724_v3 }
  0x42   :  { %237 = vmatpush1.bf16.msra.mxu0 %v1851_v22 }
  0x43   :  { %238 = vmatprep.subr.bf16.mxu0 %v1858_v25 }
  0x44   :  { %1352 = vmatpush3.bf16.msra.mxu1 %v1878_v31 }
  0x45   :  { %1353 = vmatprep.subr.bf16.mxu1 %v1724_v3 }
  0x46   :  { %239 = vmatpush1.bf16.msra.mxu0 %v1863_v26 }
  0x47   :  { %348 = vmatprep.subr.bf16.mxu0 %v1785_v1 }
  0x48   :  { %1354 = vmatpush3.bf16.msra.mxu1 %v1884_v33 }
  0x49   :  { %257 = vmatmul.mubr.bf16.vlgmr.msra.gmra.mrb[0].mxu0 %v95_v30  ;;  %1359 = vmatprep.subr.bf16.mxu1 %v1724_v3 }
  0x4a   :  { %349 = vmatpush1.bf16.msra.mxu0 %v1787_v2  ;;  %380 = vmatprep.mubr.bf16.mxu0 %v1725_v4 }
  0x4b   :  { %350 = vmatprep.subr.bf16.mxu0 %v1792_v5  ;;  %1356 = vmatmul.mubr.bf16.vlgmr.msra.gmra.mrb[0].mxu1 %v95_v30 }
  0x4c   :  { %1360 = vmatpush3.bf16.msra.mxu1 %v1810_v10  ;;  %1375 = vmatprep.mubr.msk.bf16.mxu1 %vm1726_vm0, %v1724_v3 }
  0x4d   :  { %1361 = vmatprep.subr.bf16.mxu1 %v1724_v3 }
  0x4e   :  { %351 = vmatpush1.bf16.msra.mxu0 %v1797_v6 }
  0x4f   :  { %352 = vmatprep.subr.bf16.mxu0 %v1801_v7 }
  0x50   :  { %1362 = vmatpush3.bf16.msra.mxu1 %v1820_v13 }
  0x51   :  { %1363 = vmatprep.subr.bf16.mxu1 %v1724_v3 }
  0x52   :  { %353 = vmatpush1.bf16.msra.mxu0 %v1805_v8 }
  0x53   :  { %354 = vmatprep.subr.bf16.mxu0 %v1808_v9 }
  0x54   :  { %1364 = vmatpush3.bf16.msra.mxu1 %v1826_v15 }
  0x55   :  { %1365 = vmatprep.subr.bf16.mxu1 %v1724_v3 }
  0x56   :  { %355 = vmatpush1.bf16.msra.mxu0 %v1813_v11 }
  0x57   :  { %356 = vmatprep.subr.bf16.mxu0 %v1817_v12 }
  0x58   :  { %1366 = vmatpush3.bf16.msra.mxu1 %v1836_v18 }
  0x59   :  { %1367 = vmatprep.subr.bf16.mxu1 %v1724_v3 }
  0x5a   :  { %357 = vmatpush1.bf16.msra.mxu0 %v1822_v14 }
  0x5b   :  { %358 = vmatprep.subr.bf16.mxu0 %v1829_v16 }
  0x5c   :  { %1368 = vmatpush3.bf16.msra.mxu1 %v1854_v23 }
  0x5d   :  { %1369 = vmatprep.subr.bf16.mxu1 %v1724_v3 }
  0x5e   :  { %359 = vmatpush1.bf16.msra.mxu0 %v1833_v17 }
  0x5f   :  { %360 = vmatprep.subr.bf16.mxu0 %v1844_v20 }
  0x60   :  { %1370 = vmatpush3.bf16.msra.mxu1 %v1868_v28 }
  0x61   :  { %1371 = vmatprep.subr.bf16.mxu1 %v1724_v3 }
  0x62   :  { %361 = vmatpush1.bf16.msra.mxu0 %v1851_v22 }
  0x63   :  { %362 = vmatprep.subr.bf16.mxu0 %v1858_v25 }
  0x64   :  { %1372 = vmatpush3.bf16.msra.mxu1 %v1878_v31 }
  0x65   :  { %1373 = vmatprep.subr.bf16.mxu1 %v1724_v3 }
  0x66   :  { %363 = vmatpush1.bf16.msra.mxu0 %v1863_v26 }
  0x67   :  { %468 = vmatprep.subr.bf16.mxu0 %v1785_v1 }
  0x68   :  { %1374 = vmatpush3.bf16.msra.mxu1 %v1884_v33 }
  0x69   :  { %1379 = vmatprep.subr.bf16.mxu1 %v1724_v3 }
  0xb0   :  { %v344_v63 = vpop.permute.xlu0 %343 }
  0xb1   :  { %vm345_vm5 = vcmp.eq.s32.totalorder %v344_v63, 1 }
 0x11c   :  { %v258_v36 = vpop.f32.mrb[0].mxu0 }
 0x11d   :  { %v307_v38 = vadd.f32 %v306_v35, %v258_v36  ;;  %v260_v39 = vpop.f32.mrb[1].mxu0  ;;  %v1181_v35 = vsel %vm1265_vm9, 1, %v1725_v4  ;;  %v431_v36 = vunpack.c.h.bf16 %v1929_v53 }
 0x11e   :  { %v262_v40 = vpop.f32.mrb[2].mxu0  ;;  %v316_v43 = vadd.f32 %v315_v37, %v260_v39  ;;  %v299_v45 = vpop.f32.mrb[0].mxu1  ;;  %v1983_v37 = vld [vmem:[#allocation5 + $0x10] ss:$12 sps:$4 sm:$0xff]  }
 0x11f   :  { %v1241_v41 = vmul.f32 -1.442695, %v307_v38  ;;  %v263_v42 = vpop.f32.mrb[3].mxu0  ;;  %v1357_v46 = vpop.f32.mrb[1].mxu1  ;;  %v331_v55 = vadd.f32 %v1927_v52, %v299_v45  ;;  %v440_v40 = vunpack.c.l.bf16 %v1983_v37 }
 0x120   :  { %v1242_v44 = vmul.f32 -1.442695, %v316_v43  ;;  %v302_v47 = vpop.f32.mrb[2].mxu1 }
 0x121   :  { %1542 = vpow2.f32 %v1241_v41  ;;  %v1358_v48 = vpop.f32.mrb[3].mxu1 }
 0x122   :  { %1544 = vpow2.f32 %v1242_v44 }
 0x12b   :  { %v1543_v49 = vpop.eup %1542 }
 0x12c   :  { %v311_v50 = vadd.f32 1.0, %v1543_v49  ;;  %v1545_v51 = vpop.eup %1544 }
 0x12d   :  { %v320_v54 = vadd.f32 1.0, %v1545_v51 }
 0x12e   :  { %1546 = vrcp.f32 %v311_v50 }
 0x12f   :  { %1548 = vrcp.f32 %v320_v54  ;;  %v448_v54 = vld [vmem:[#allocation5 + $0x14] sm:$0xff]  }
 0x138   :  { %v1547_v57 = vpop.eup %1546 }
 0x139   :  { %v332_v58 = vmul.f32 %v1547_v57, %v331_v55  ;;  %v1549_v60 = vpop.eup %1548 }
 0x13a   :  { %v335_v61 = vsub.f32 1.0, %v1549_v60  ;;  %v337_v21 = vmul.f32 %v1549_v60, %v1865_v27 }
 0x13b   :  { %v333_v59 = vadd.f32 %v332_v58, %v324_v56  ;;  %v449_v56 = vunpack.c.l.bf16 %v448_v54 }
 0x13d   :  { %1550 = vtanh.f32 %v333_v59 }
 0x147   :  { %v1551_v62 = vpop.eup %1550 }
 0x148   :  { %v336_v0 = vmul.f32 %v1551_v62, %v335_v61 }
 0x14a   :  { %v338_v24 = vadd.f32 %v337_v21, %v336_v0 }
 0x14c   :  { %v1935_v29 = vsel %vm345_vm5, %v338_v24, %v1865_v27  ;;  %v581_v27 = vsel %vm1250_vm6, 1, %v1725_v4  ;;  %v464_v24 = vpop.permute.xlu0 %463 }
 0x14d   :  { %v347_v30 = vpack.c.bf16 %v1935_v29, %v1935_v29  ;;  %583 = vperm.xlu1 %1509, %v581_v27   ;;  %vm465_vm10 = vcmp.eq.s32.totalorder %v464_v24, 1 }
 0x14f   :  { %381 = vmatmul.mubr.bf16.vlgmr.msra.gmra.mrb[4].mxu0 %v347_v30  ;;  %1376 = vmatmul.mubr.bf16.vlgmr.msra.gmra.mrb[4].mxu1 %v347_v30 }
 0x150   :  { %469 = vmatpush1.bf16.msra.mxu0 %v1787_v2  ;;  %1380 = vmatpush3.bf16.msra.mxu1 %v1810_v10 }
 0x151   :  { %470 = vmatprep.subr.bf16.mxu0 %v1792_v5  ;;  %1381 = vmatprep.subr.bf16.mxu1 %v1724_v3 }
 0x152   :  { %500 = vmatprep.mubr.bf16.mxu0 %v1725_v4  ;;  %1395 = vmatprep.mubr.msk.bf16.mxu1 %vm1726_vm0, %v1724_v3 }
 0x153   :  { %703 = vperm.xlu1 %1509, %v701_v32  }
 0x154   :  { %471 = vmatpush1.bf16.msra.mxu0 %v1797_v6  ;;  %1382 = vmatpush3.bf16.msra.mxu1 %v1820_v13 }
 0x155   :  { %472 = vmatprep.subr.bf16.mxu0 %v1801_v7  ;;  %1383 = vmatprep.subr.bf16.mxu1 %v1724_v3 }
 0x157   :  { %943 = vperm.xlu1 %1509, %v941_v34  }
 0x158   :  { %473 = vmatpush1.bf16.msra.mxu0 %v1805_v8  ;;  %1384 = vmatpush3.bf16.msra.mxu1 %v1826_v15 }
 0x159   :  { %474 = vmatprep.subr.bf16.mxu0 %v1808_v9  ;;  %1385 = vmatprep.subr.bf16.mxu1 %v1724_v3 }
 0x15b   :  { %1183 = vperm.xlu1 %1509, %v1181_v35  }
 0x15c   :  { %475 = vmatpush1.bf16.msra.mxu0 %v1813_v11  ;;  %1386 = vmatpush3.bf16.msra.mxu1 %v1836_v18 }
 0x15d   :  { %476 = vmatprep.subr.bf16.mxu0 %v1817_v12  ;;  %1387 = vmatprep.subr.bf16.mxu1 %v1724_v3 }
 0x160   :  { %477 = vmatpush1.bf16.msra.mxu0 %v1822_v14  ;;  %1388 = vmatpush3.bf16.msra.mxu1 %v1854_v23 }
 0x161   :  { %478 = vmatprep.subr.bf16.mxu0 %v1829_v16  ;;  %1389 = vmatprep.subr.bf16.mxu1 %v1724_v3 }
 0x164   :  { %479 = vmatpush1.bf16.msra.mxu0 %v1833_v17  ;;  %1390 = vmatpush3.bf16.msra.mxu1 %v1868_v28 }
 0x165   :  { %480 = vmatprep.subr.bf16.mxu0 %v1844_v20  ;;  %1391 = vmatprep.subr.bf16.mxu1 %v1724_v3 }
 0x168   :  { %481 = vmatpush1.bf16.msra.mxu0 %v1851_v22  ;;  %1392 = vmatpush3.bf16.msra.mxu1 %v1878_v31 }
 0x169   :  { %482 = vmatprep.subr.bf16.mxu0 %v1858_v25  ;;  %1393 = vmatprep.subr.bf16.mxu1 %v1724_v3 }
 0x16c   :  { %483 = vmatpush1.bf16.msra.mxu0 %v1863_v26  ;;  %1394 = vmatpush3.bf16.msra.mxu1 %v1884_v33 }
 0x16d   :  { %588 = vmatprep.subr.bf16.mxu0 %v1785_v1  ;;  %1399 = vmatprep.subr.bf16.mxu1 %v1724_v3 }
 0x222   :  { %v382_v38 = vpop.f32.mrb[4].mxu0  ;;  %v423_v39 = vpop.f32.mrb[4].mxu1 }
 0x223   :  { %v432_v41 = vadd.f32 %v431_v36, %v382_v38  ;;  %v384_v42 = vpop.f32.mrb[5].mxu0  ;;  %v1377_v43 = vpop.f32.mrb[5].mxu1  ;;  %v450_v57 = vadd.f32 %v1927_v52, %v423_v39  ;;  %v560_v36 = vunpack.c.h.bf16 %v1983_v37 }
 0x224   :  { %v386_v44 = vpop.f32.mrb[6].mxu0  ;;  %v426_v45 = vpop.f32.mrb[6].mxu1  ;;  %v441_v48 = vadd.f32 %v440_v40, %v384_v42 }
 0x225   :  { %v1245_v46 = vmul.f32 -1.442695, %v432_v41  ;;  %v387_v47 = vpop.f32.mrb[7].mxu0  ;;  %v1378_v19 = vpop.f32.mrb[7].mxu1 }
 0x226   :  { %v1246_v49 = vmul.f32 -1.442695, %v441_v48 }
 0x227   :  { %1552 = vpow2.f32 %v1245_v46 }
 0x228   :  { %1554 = vpow2.f32 %v1246_v49 }
 0x231   :  { %v1553_v50 = vpop.eup %1552 }
 0x232   :  { %v436_v51 = vadd.f32 1.0, %v1553_v50  ;;  %v1555_v53 = vpop.eup %1554  ;;  %v568_v50 = vld [vmem:[#allocation5 + $0x20] sm:$0xff]  }
 0x233   :  { %v445_v55 = vadd.f32 1.0, %v1555_v53  ;;  %v569_v53 = vunpack.c.l.bf16 %v568_v50  ;;  %v671_v24 = vunpack.c.h.bf16 %v568_v50 }
 0x234   :  { %1556 = vrcp.f32 %v436_v51 }
 0x235   :  { %1558 = vrcp.f32 %v445_v55 }
 0x23e   :  { %v1557_v58 = vpop.eup %1556 }
 0x23f   :  { %v451_v59 = vmul.f32 %v1557_v58, %v450_v57  ;;  %v1559_v61 = vpop.eup %1558 }
 0x240   :  { %v454_v62 = vsub.f32 1.0, %v1559_v61  ;;  %v456_v0 = vmul.f32 %v1559_v61, %v1935_v29 }
 0x241   :  { %v452_v60 = vadd.f32 %v451_v59, %v449_v56 }
 0x243   :  { %1560 = vtanh.f32 %v452_v60  ;;  %v584_v60 = vpop.permute.xlu1 %583 }
 0x244   :  { %vm585_vm11 = vcmp.eq.s32.totalorder %v584_v60, 1 }
 0x24d   :  { %v1561_v63 = vpop.eup %1560 }
 0x24e   :  { %v455_v21 = vmul.f32 %v1561_v63, %v454_v62 }
 0x250   :  { %v457_v30 = vadd.f32 %v456_v0, %v455_v21 }
 0x252   :  { %v1989_v27 = vsel %vm465_vm10, %v457_v30, %v1935_v29  ;;  %v551_v29 = vunpack.c.h.bf16 %v448_v54  ;;  %v2071_v30 = vld [vmem:[#allocation5 + $0x28] ss:$12 sps:$4 sm:$0xff]  }
 0x253   :  { %v467_v32 = vpack.c.bf16 %v1989_v27, %v1989_v27 }
 0x255   :  { %501 = vmatmul.mubr.bf16.vlgmr.msra.gmra.mrb[8].mxu0 %v467_v32  ;;  %1396 = vmatmul.mubr.bf16.vlgmr.msra.gmra.mrb[8].mxu1 %v467_v32 }
 0x256   :  { %589 = vmatpush1.bf16.msra.mxu0 %v1787_v2  ;;  %1400 = vmatpush3.bf16.msra.mxu1 %v1810_v10 }
 0x257   :  { %590 = vmatprep.subr.bf16.mxu0 %v1792_v5  ;;  %1401 = vmatprep.subr.bf16.mxu1 %v1724_v3 }
 0x258   :  { %620 = vmatprep.mubr.bf16.mxu0 %v1725_v4  ;;  %1415 = vmatprep.mubr.msk.bf16.mxu1 %vm1726_vm0, %v1724_v3 }
 0x25a   :  { %591 = vmatpush1.bf16.msra.mxu0 %v1797_v6  ;;  %1402 = vmatpush3.bf16.msra.mxu1 %v1820_v13 }
 0x25b   :  { %592 = vmatprep.subr.bf16.mxu0 %v1801_v7  ;;  %1403 = vmatprep.subr.bf16.mxu1 %v1724_v3 }
 0x25e   :  { %593 = vmatpush1.bf16.msra.mxu0 %v1805_v8  ;;  %1404 = vmatpush3.bf16.msra.mxu1 %v1826_v15 }
 0x25f   :  { %594 = vmatprep.subr.bf16.mxu0 %v1808_v9  ;;  %1405 = vmatprep.subr.bf16.mxu1 %v1724_v3 }
 0x262   :  { %595 = vmatpush1.bf16.msra.mxu0 %v1813_v11  ;;  %1406 = vmatpush3.bf16.msra.mxu1 %v1836_v18 }
 0x263   :  { %596 = vmatprep.subr.bf16.mxu0 %v1817_v12  ;;  %1407 = vmatprep.subr.bf16.mxu1 %v1724_v3 }
 0x266   :  { %597 = vmatpush1.bf16.msra.mxu0 %v1822_v14  ;;  %1408 = vmatpush3.bf16.msra.mxu1 %v1854_v23 }
 0x267   :  { %598 = vmatprep.subr.bf16.mxu0 %v1829_v16  ;;  %1409 = vmatprep.subr.bf16.mxu1 %v1724_v3 }
 0x26a   :  { %599 = vmatpush1.bf16.msra.mxu0 %v1833_v17  ;;  %1410 = vmatpush3.bf16.msra.mxu1 %v1868_v28 }
 0x26b   :  { %600 = vmatprep.subr.bf16.mxu0 %v1844_v20  ;;  %1411 = vmatprep.subr.bf16.mxu1 %v1724_v3 }
 0x26e   :  { %601 = vmatpush1.bf16.msra.mxu0 %v1851_v22  ;;  %1412 = vmatpush3.bf16.msra.mxu1 %v1878_v31 }
 0x26f   :  { %602 = vmatprep.subr.bf16.mxu0 %v1858_v25  ;;  %1413 = vmatprep.subr.bf16.mxu1 %v1724_v3 }
 0x272   :  { %603 = vmatpush1.bf16.msra.mxu0 %v1863_v26  ;;  %1414 = vmatpush3.bf16.msra.mxu1 %v1884_v33 }
 0x273   :  { %708 = vmatprep.subr.bf16.mxu0 %v1785_v1  ;;  %1419 = vmatprep.subr.bf16.mxu1 %v1724_v3 }
 0x328   :  { %v502_v34 = vpop.f32.mrb[8].mxu0  ;;  %v543_v35 = vpop.f32.mrb[8].mxu1 }
 0x329   :  { %v552_v38 = vadd.f32 %v551_v29, %v502_v34  ;;  %v504_v39 = vpop.f32.mrb[9].mxu0  ;;  %v1397_v40 = vpop.f32.mrb[9].mxu1  ;;  %v570_v37 = vadd.f32 %v1927_v52, %v543_v35  ;;  %v680_v29 = vunpack.c.l.bf16 %v2071_v30 }
 0x32a   :  { %v506_v41 = vpop.f32.mrb[10].mxu0  ;;  %v546_v42 = vpop.f32.mrb[10].mxu1  ;;  %v561_v46 = vadd.f32 %v560_v36, %v504_v39 }
 0x32b   :  { %v1248_v43 = vmul.f32 -1.442695, %v552_v38  ;;  %v507_v44 = vpop.f32.mrb[11].mxu0  ;;  %v1398_v45 = vpop.f32.mrb[11].mxu1 }
 0x32c   :  { %v1249_v47 = vmul.f32 -1.442695, %v561_v46 }
 0x32d   :  { %1562 = vpow2.f32 %v1248_v43 }
 0x32e   :  { %1564 = vpow2.f32 %v1249_v47 }
 0x337   :  { %v1563_v19 = vpop.eup %1562 }
 0x338   :  { %v556_v48 = vadd.f32 1.0, %v1563_v19  ;;  %v1565_v49 = vpop.eup %1564  ;;  %v688_v19 = vld [vmem:[#allocation5 + $0x2c] sm:$0xff]  }
 0x339   :  { %v565_v51 = vadd.f32 1.0, %v1565_v49  ;;  %v689_v49 = vunpack.c.l.bf16 %v688_v19 }
 0x33a   :  { %1566 = vrcp.f32 %v556_v48 }
 0x33b   :  { %1568 = vrcp.f32 %v565_v51 }
 0x344   :  { %v1567_v54 = vpop.eup %1566 }
 0x345   :  { %v571_v55 = vmul.f32 %v1567_v54, %v570_v37  ;;  %v1569_v57 = vpop.eup %1568 }
 0x346   :  { %v574_v58 = vsub.f32 1.0, %v1569_v57  ;;  %v576_v62 = vmul.f32 %v1569_v57, %v1989_v27 }
 0x347   :  { %v572_v56 = vadd.f32 %v571_v55, %v569_v53 }
 0x349   :  { %1570 = vtanh.f32 %v572_v56 }
 0x353   :  { %v1571_v59 = vpop.eup %1570 }
 0x354   :  { %v575_v61 = vmul.f32 %v1571_v59, %v574_v58  ;;  %v704_v59 = vpop.permute.xlu1 %703 }
 0x355   :  { %vm705_vm12 = vcmp.eq.s32.totalorder %v704_v59, 1 }
 0x356   :  { %v577_v63 = vadd.f32 %v576_v62, %v575_v61 }
 0x358   :  { %v2032_v0 = vsel %vm585_vm11, %v577_v63, %v1989_v27  ;;  %v791_v63 = vunpack.c.h.bf16 %v688_v19 }
 0x359   :  { %v587_v21 = vpack.c.bf16 %v2032_v0, %v2032_v0 }
 0x35b   :  { %621 = vmatmul.mubr.bf16.vlgmr.msra.gmra.mrb[12].mxu0 %v587_v21  ;;  %1416 = vmatmul.mubr.bf16.vlgmr.msra.gmra.mrb[12].mxu1 %v587_v21 }
 0x35c   :  { %709 = vmatpush1.bf16.msra.mxu0 %v1787_v2  ;;  %1420 = vmatpush3.bf16.msra.mxu1 %v1810_v10 }
 0x35d   :  { %710 = vmatprep.subr.bf16.mxu0 %v1792_v5  ;;  %1421 = vmatprep.subr.bf16.mxu1 %v1724_v3 }
 0x35e   :  { %740 = vmatprep.mubr.bf16.mxu0 %v1725_v4  ;;  %1435 = vmatprep.mubr.msk.bf16.mxu1 %vm1726_vm0, %v1724_v3 }
 0x360   :  { %711 = vmatpush1.bf16.msra.mxu0 %v1797_v6  ;;  %1422 = vmatpush3.bf16.msra.mxu1 %v1820_v13 }
 0x361   :  { %712 = vmatprep.subr.bf16.mxu0 %v1801_v7  ;;  %1423 = vmatprep.subr.bf16.mxu1 %v1724_v3 }
 0x364   :  { %713 = vmatpush1.bf16.msra.mxu0 %v1805_v8  ;;  %1424 = vmatpush3.bf16.msra.mxu1 %v1826_v15 }
 0x365   :  { %714 = vmatprep.subr.bf16.mxu0 %v1808_v9  ;;  %1425 = vmatprep.subr.bf16.mxu1 %v1724_v3 }
 0x368   :  { %715 = vmatpush1.bf16.msra.mxu0 %v1813_v11  ;;  %1426 = vmatpush3.bf16.msra.mxu1 %v1836_v18 }
 0x369   :  { %716 = vmatprep.subr.bf16.mxu0 %v1817_v12  ;;  %1427 = vmatprep.subr.bf16.mxu1 %v1724_v3 }
 0x36c   :  { %717 = vmatpush1.bf16.msra.mxu0 %v1822_v14  ;;  %1428 = vmatpush3.bf16.msra.mxu1 %v1854_v23 }
 0x36d   :  { %718 = vmatprep.subr.bf16.mxu0 %v1829_v16  ;;  %1429 = vmatprep.subr.bf16.mxu1 %v1724_v3 }
 0x370   :  { %719 = vmatpush1.bf16.msra.mxu0 %v1833_v17  ;;  %1430 = vmatpush3.bf16.msra.mxu1 %v1868_v28 }
 0x371   :  { %720 = vmatprep.subr.bf16.mxu0 %v1844_v20  ;;  %1431 = vmatprep.subr.bf16.mxu1 %v1724_v3 }
 0x374   :  { %721 = vmatpush1.bf16.msra.mxu0 %v1851_v22  ;;  %1432 = vmatpush3.bf16.msra.mxu1 %v1878_v31 }
 0x375   :  { %722 = vmatprep.subr.bf16.mxu0 %v1858_v25  ;;  %1433 = vmatprep.subr.bf16.mxu1 %v1724_v3 }
 0x378   :  { %723 = vmatpush1.bf16.msra.mxu0 %v1863_v26  ;;  %1434 = vmatpush3.bf16.msra.mxu1 %v1884_v33 }
 0x379   :  { %828 = vmatprep.subr.bf16.mxu0 %v1785_v1  ;;  %1439 = vmatprep.subr.bf16.mxu1 %v1724_v3 }
 0x42e   :  { %v622_v27 = vpop.f32.mrb[12].mxu0  ;;  %v663_v32 = vpop.f32.mrb[12].mxu1 }
 0x42f   :  { %v672_v34 = vadd.f32 %v671_v24, %v622_v27  ;;  %v624_v35 = vpop.f32.mrb[13].mxu0  ;;  %v1417_v36 = vpop.f32.mrb[13].mxu1  ;;  %v690_v50 = vadd.f32 %v1927_v52, %v663_v32  ;;  %v800_v24 = vunpack.c.h.bf16 %v2071_v30 }
 0x430   :  { %v626_v38 = vpop.f32.mrb[14].mxu0  ;;  %v666_v39 = vpop.f32.mrb[14].mxu1  ;;  %v681_v43 = vadd.f32 %v680_v29, %v624_v35 }
 0x431   :  { %v1251_v40 = vmul.f32 -1.442695, %v672_v34  ;;  %v627_v41 = vpop.f32.mrb[15].mxu0  ;;  %v1418_v42 = vpop.f32.mrb[15].mxu1 }
 0x432   :  { %v1252_v44 = vmul.f32 -1.442695, %v681_v43 }
 0x433   :  { %1572 = vpow2.f32 %v1251_v40 }
 0x434   :  { %1574 = vpow2.f32 %v1252_v44  ;;  %v808_v44 = vld [vmem:[#allocation5 + $0x38] sm:$0xff]  }
 0x43d   :  { %v1573_v45 = vpop.eup %1572 }
 0x43e   :  { %v676_v46 = vadd.f32 1.0, %v1573_v45  ;;  %v1575_v47 = vpop.eup %1574 }
 0x43f   :  { %v685_v48 = vadd.f32 1.0, %v1575_v47 }
 0x440   :  { %1576 = vrcp.f32 %v676_v46  ;;  %v809_v46 = vunpack.c.l.bf16 %v808_v44 }
 0x441   :  { %1578 = vrcp.f32 %v685_v48 }
 0x44a   :  { %v1577_v51 = vpop.eup %1576 }
 0x44b   :  { %v691_v53 = vmul.f32 %v1577_v51, %v690_v50  ;;  %v1579_v54 = vpop.eup %1578 }
 0x44c   :  { %v694_v55 = vsub.f32 1.0, %v1579_v54  ;;  %v696_v57 = vmul.f32 %v1579_v54, %v2032_v0  ;;  %v824_v54 = vpop.permute.xlu0 %823 }
 0x44d   :  { %v692_v37 = vadd.f32 %v691_v53, %v689_v49  ;;  %vm825_vm13 = vcmp.eq.s32.totalorder %v824_v54, 1 }
 0x44f   :  { %1580 = vtanh.f32 %v692_v37 }
 0x459   :  { %v1581_v56 = vpop.eup %1580 }
 0x45a   :  { %v695_v58 = vmul.f32 %v1581_v56, %v694_v55 }
 0x45c   :  { %v697_v60 = vadd.f32 %v696_v57, %v695_v58 }
 0x45e   :  { %v2077_v61 = vsel %vm705_vm12, %v697_v60, %v2032_v0 }
 0x45f   :  { %v707_v62 = vpack.c.bf16 %v2077_v61, %v2077_v61 }
 0x461   :  { %741 = vmatmul.mubr.bf16.vlgmr.msra.gmra.mrb[16].mxu0 %v707_v62  ;;  %1436 = vmatmul.mubr.bf16.vlgmr.msra.gmra.mrb[16].mxu1 %v707_v62 }
 0x462   :  { %829 = vmatpush1.bf16.msra.mxu0 %v1787_v2  ;;  %1440 = vmatpush3.bf16.msra.mxu1 %v1810_v10 }
 0x463   :  { %830 = vmatprep.subr.bf16.mxu0 %v1792_v5  ;;  %1441 = vmatprep.subr.bf16.mxu1 %v1724_v3 }
 0x464   :  { %860 = vmatprep.mubr.bf16.mxu0 %v1725_v4  ;;  %1455 = vmatprep.mubr.msk.bf16.mxu1 %vm1726_vm0, %v1724_v3 }
 0x466   :  { %831 = vmatpush1.bf16.msra.mxu0 %v1797_v6  ;;  %1442 = vmatpush3.bf16.msra.mxu1 %v1820_v13 }
 0x467   :  { %832 = vmatprep.subr.bf16.mxu0 %v1801_v7  ;;  %1443 = vmatprep.subr.bf16.mxu1 %v1724_v3 }
 0x46a   :  { %833 = vmatpush1.bf16.msra.mxu0 %v1805_v8  ;;  %1444 = vmatpush3.bf16.msra.mxu1 %v1826_v15 }
 0x46b   :  { %834 = vmatprep.subr.bf16.mxu0 %v1808_v9  ;;  %1445 = vmatprep.subr.bf16.mxu1 %v1724_v3 }
 0x46e   :  { %835 = vmatpush1.bf16.msra.mxu0 %v1813_v11  ;;  %1446 = vmatpush3.bf16.msra.mxu1 %v1836_v18 }
 0x46f   :  { %836 = vmatprep.subr.bf16.mxu0 %v1817_v12  ;;  %1447 = vmatprep.subr.bf16.mxu1 %v1724_v3 }
 0x472   :  { %837 = vmatpush1.bf16.msra.mxu0 %v1822_v14  ;;  %1448 = vmatpush3.bf16.msra.mxu1 %v1854_v23 }
 0x473   :  { %838 = vmatprep.subr.bf16.mxu0 %v1829_v16  ;;  %1449 = vmatprep.subr.bf16.mxu1 %v1724_v3 }
 0x476   :  { %839 = vmatpush1.bf16.msra.mxu0 %v1833_v17  ;;  %1450 = vmatpush3.bf16.msra.mxu1 %v1868_v28 }
 0x477   :  { %840 = vmatprep.subr.bf16.mxu0 %v1844_v20  ;;  %1451 = vmatprep.subr.bf16.mxu1 %v1724_v3 }
 0x47a   :  { %841 = vmatpush1.bf16.msra.mxu0 %v1851_v22  ;;  %1452 = vmatpush3.bf16.msra.mxu1 %v1878_v31 }
 0x47b   :  { %842 = vmatprep.subr.bf16.mxu0 %v1858_v25  ;;  %1453 = vmatprep.subr.bf16.mxu1 %v1724_v3 }
 0x47e   :  { %843 = vmatpush1.bf16.msra.mxu0 %v1863_v26  ;;  %1454 = vmatpush3.bf16.msra.mxu1 %v1884_v33 }
 0x47f   :  { %948 = vmatprep.subr.bf16.mxu0 %v1785_v1  ;;  %1459 = vmatprep.subr.bf16.mxu1 %v1724_v3 }
 0x534   :  { %v742_v0 = vpop.f32.mrb[16].mxu0  ;;  %v783_v21 = vpop.f32.mrb[16].mxu1 }
 0x535   :  { %v792_v27 = vadd.f32 %v791_v63, %v742_v0  ;;  %v744_v32 = vpop.f32.mrb[17].mxu0  ;;  %v1437_v29 = vpop.f32.mrb[17].mxu1  ;;  %v810_v30 = vadd.f32 %v1927_v52, %v783_v21 }
 0x536   :  { %v746_v34 = vpop.f32.mrb[18].mxu0  ;;  %v786_v35 = vpop.f32.mrb[18].mxu1  ;;  %v801_v40 = vadd.f32 %v800_v24, %v744_v32 }
 0x537   :  { %v1254_v36 = vmul.f32 -1.442695, %v792_v27  ;;  %v747_v38 = vpop.f32.mrb[19].mxu0  ;;  %v1438_v39 = vpop.f32.mrb[19].mxu1 }
 0x538   :  { %v1255_v41 = vmul.f32 -1.442695, %v801_v40  ;;  %v944_v29 = vpop.permute.xlu1 %943  ;;  %v1623_v38 = vld [vmem:[#allocation8] ss:$12 sps:$4 sm:$0xff]   ;;  %v1624_v39 = vld [vmem:[#allocation8 + $0x8] ss:$12 sps:$4 sm:$0xff]  }
 0x539   :  { %1582 = vpow2.f32 %v1254_v36  ;;  %vm945_vm14 = vcmp.eq.s32.totalorder %v944_v29, 1  ;;  %v1625_v40 = vld [vmem:[#allocation8 + $0x1c] ss:$12 sps:$4 sm:$0xff]  }
 0x53a   :  { %1584 = vpow2.f32 %v1255_v41  ;;  %v1626_v41 = vld [vmem:[#allocation8 + $0x18] ss:$12 sps:$4 sm:$0xff]  }
 0x543   :  { %v1583_v1 = vpop.eup %1582 }
 0x544   :  { %v796_v42 = vadd.f32 1.0, %v1583_v1  ;;  %v1585_v43 = vpop.eup %1584  ;;  %v1627_v1 = vld [vmem:[#allocation8 + $0x20] ss:$12 sps:$4 sm:$0xff]  }
 0x545   :  { %v805_v45 = vadd.f32 1.0, %v1585_v43  ;;  %v1629_v43 = vld [vmem:[#allocation8 + $0x30] ss:$12 sps:$4 sm:$0xff]  }
 0x546   :  { %1586 = vrcp.f32 %v796_v42  ;;  %v1628_v42 = vld [vmem:[#allocation8 + $0x34] ss:$12 sps:$4 sm:$0xff]  }
 0x547   :  { %1588 = vrcp.f32 %v805_v45  ;;  %v1631_v45 = vld [vmem:[#allocation8 + $0x4c] ss:$12 sps:$4 sm:$0xff]  }
 0x550   :  { %v1587_v47 = vpop.eup %1586 }
 0x551   :  { %v811_v19 = vmul.f32 %v1587_v47, %v810_v30  ;;  %v1589_v49 = vpop.eup %1588  ;;  %v1634_v30 = vld [vmem:[#allocation8 + $0x64] ss:$12 sps:$4 sm:$0xff]   ;;  %v1635_v47 = vld [vmem:[#allocation8 + $0x60] ss:$12 sps:$4 sm:$0xff]  }
 0x552   :  { %v814_v50 = vsub.f32 1.0, %v1589_v49  ;;  %v816_v53 = vmul.f32 %v1589_v49, %v2077_v61  ;;  %v1638_v49 = vld [vmem:[#allocation8 + $0x78] ss:$12 sps:$4 sm:$0xff]  }
 0x553   :  { %v812_v48 = vadd.f32 %v811_v19, %v809_v46  ;;  %v1633_v46 = vld [vmem:[#allocation8 + $0x50] ss:$12 sps:$4 sm:$0xff]   ;;  %v1636_v19 = vld [vmem:[#allocation8 + $0x68] ss:$12 sps:$4 sm:$0xff]  }
 0x555   :  { %1590 = vtanh.f32 %v812_v48  ;;  %v1637_v48 = vld [vmem:[#allocation8 + $0x7c] ss:$12 sps:$4 sm:$0xff]  }
 0x55f   :  { %v1591_v51 = vpop.eup %1590 }
 0x560   :  { %v815_v37 = vmul.f32 %v1591_v51, %v814_v50  ;;  %v1639_v50 = vld [vmem:[#allocation8 + $0x94] ss:$12 sps:$4 sm:$0xff]   ;;  %v1640_v51 = vld [vmem:[#allocation8 + $0x90] ss:$12 sps:$4 sm:$0xff]  }
 0x562   :  { %v817_v55 = vadd.f32 %v816_v53, %v815_v37  ;;  %v1641_v53 = vld [vmem:[#allocation8 + $0xac] ss:$12 sps:$4 sm:$0xff]   ;;  %v1642_v37 = vld [vmem:[#allocation8 + $0xa8] ss:$12 sps:$4 sm:$0xff]  }
 0x564   :  { %v2120_v56 = vsel %vm825_vm13, %v817_v55, %v2077_v61 }
 0x565   :  { %v827_v57 = vpack.c.bf16 %v2120_v56, %v2120_v56 }
 0x567   :  { %861 = vmatmul.mubr.bf16.vlgmr.msra.gmra.mrb[20].mxu0 %v827_v57  ;;  %1456 = vmatmul.mubr.bf16.vlgmr.msra.gmra.mrb[20].mxu1 %v827_v57 }
 0x568   :  { %949 = vmatpush1.bf16.msra.mxu0 %v1787_v2  ;;  %1460 = vmatpush3.bf16.msra.mxu1 %v1810_v10  ;;  %v1622_v2 = vld [vmem:[#allocation8 + $0x4] ss:$12 sps:$4 sm:$0xff]  }
 0x569   :  { %950 = vmatprep.subr.bf16.mxu0 %v1792_v5  ;;  %1461 = vmatprep.subr.bf16.mxu1 %v1724_v3  ;;  %v911_v5 = vunpack.c.h.bf16 %v808_v44  ;;  %v1630_v44 = vld [vmem:[#allocation8 + $0x38] ss:$12 sps:$4 sm:$0xff]  }
 0x56a   :  { %980 = vmatprep.mubr.bf16.mxu0 %v1725_v4  ;;  %1475 = vmatprep.mubr.msk.bf16.mxu1 %vm1726_vm0, %v1724_v3 }
 0x56c   :  { %951 = vmatpush1.bf16.msra.mxu0 %v1797_v6  ;;  %1462 = vmatpush3.bf16.msra.mxu1 %v1820_v13  ;;  %v2158_v6 = vld [vmem:[#allocation5 + $0x40] ss:$12 sps:$4 sm:$0xff]  }
 0x56d   :  { %952 = vmatprep.subr.bf16.mxu0 %v1801_v7  ;;  %1463 = vmatprep.subr.bf16.mxu1 %v1724_v3 }
 0x570   :  { %953 = vmatpush1.bf16.msra.mxu0 %v1805_v8  ;;  %1464 = vmatpush3.bf16.msra.mxu1 %v1826_v15 }
 0x571   :  { %954 = vmatprep.subr.bf16.mxu0 %v1808_v9  ;;  %1465 = vmatprep.subr.bf16.mxu1 %v1724_v3  ;;  %v920_v9 = vunpack.c.l.bf16 %v2158_v6 }
 0x574   :  { %955 = vmatpush1.bf16.msra.mxu0 %v1813_v11  ;;  %1466 = vmatpush3.bf16.msra.mxu1 %v1836_v18 }
 0x575   :  { %956 = vmatprep.subr.bf16.mxu0 %v1817_v12  ;;  %1467 = vmatprep.subr.bf16.mxu1 %v1724_v3 }
 0x578   :  { %957 = vmatpush1.bf16.msra.mxu0 %v1822_v14  ;;  %1468 = vmatpush3.bf16.msra.mxu1 %v1854_v23 }
 0x579   :  { %958 = vmatprep.subr.bf16.mxu0 %v1829_v16  ;;  %1469 = vmatprep.subr.bf16.mxu1 %v1724_v3 }
 0x57c   :  { %959 = vmatpush1.bf16.msra.mxu0 %v1833_v17  ;;  %1470 = vmatpush3.bf16.msra.mxu1 %v1868_v28 }
 0x57d   :  { %960 = vmatprep.subr.bf16.mxu0 %v1844_v20  ;;  %1471 = vmatprep.subr.bf16.mxu1 %v1724_v3 }
 0x580   :  { %961 = vmatpush1.bf16.msra.mxu0 %v1851_v22  ;;  %1472 = vmatpush3.bf16.msra.mxu1 %v1878_v31 }
 0x581   :  { %962 = vmatprep.subr.bf16.mxu0 %v1858_v25  ;;  %1473 = vmatprep.subr.bf16.mxu1 %v1724_v3 }
 0x584   :  { %963 = vmatpush1.bf16.msra.mxu0 %v1863_v26  ;;  %1474 = vmatpush3.bf16.msra.mxu1 %v1884_v33  ;;  %v2161_v26 = vld [vmem:[#allocation5 + $0x44] sm:$0xff]  }
 0x585   :  { %1068 = vmatprep.subr.bf16.mxu0 %v1622_v2  ;;  %1479 = vmatprep.subr.bf16.mxu1 %v1724_v3  ;;  %v929_v59 = vunpack.c.l.bf16 %v2161_v26  ;;  %v1031_v54 = vunpack.c.h.bf16 %v2161_v26  ;;  %v1064_v26 = vpop.permute.xlu0 %1063 }
 0x586   :  { %vm1065_vm15 = vcmp.eq.s32.totalorder %v1064_v26, 1 }
 0x63a   :  { %v862_v7 = vpop.f32.mrb[20].mxu0  ;;  %v903_v8 = vpop.f32.mrb[20].mxu1 }
 0x63b   :  { %v912_v10 = vadd.f32 %v911_v5, %v862_v7  ;;  %v864_v11 = vpop.f32.mrb[21].mxu0  ;;  %v1457_v12 = vpop.f32.mrb[21].mxu1  ;;  %v930_v60 = vadd.f32 %v1927_v52, %v903_v8 }
 0x63c   :  { %v866_v13 = vpop.f32.mrb[22].mxu0  ;;  %v906_v14 = vpop.f32.mrb[22].mxu1  ;;  %v921_v18 = vadd.f32 %v920_v9, %v864_v11 }
 0x63d   :  { %v1257_v15 = vmul.f32 -1.442695, %v912_v10  ;;  %v867_v16 = vpop.f32.mrb[23].mxu0  ;;  %v1458_v17 = vpop.f32.mrb[23].mxu1  ;;  %v1048_v14 = vld [vmem:[#allocation5 + $0x50] sm:$0xff]  }
 0x63e   :  { %v1258_v20 = vmul.f32 -1.442695, %v921_v18  ;;  %v1049_v16 = vunpack.c.l.bf16 %v1048_v14 }
 0x63f   :  { %1592 = vpow2.f32 %v1257_v15 }
 0x640   :  { %1594 = vpow2.f32 %v1258_v20 }
 0x649   :  { %v1593_v22 = vpop.eup %1592 }
 0x64a   :  { %v916_v23 = vadd.f32 1.0, %v1593_v22  ;;  %v1595_v25 = vpop.eup %1594 }
 0x64b   :  { %v925_v58 = vadd.f32 1.0, %v1595_v25 }
 0x64c   :  { %1596 = vrcp.f32 %v916_v23 }
 0x64d   :  { %1598 = vrcp.f32 %v925_v58 }
 0x656   :  { %v1597_v61 = vpop.eup %1596 }
 0x657   :  { %v931_v62 = vmul.f32 %v1597_v61, %v930_v60  ;;  %v1599_v0 = vpop.eup %1598 }
 0x658   :  { %v934_v21 = vsub.f32 1.0, %v1599_v0  ;;  %v936_v27 = vmul.f32 %v1599_v0, %v2120_v56  ;;  %v1168_v0 = vld [vmem:[#allocation5 + $0x58] sm:$0xff]  }
 0x659   :  { %v932_v63 = vadd.f32 %v931_v62, %v929_v59 }
 0x65b   :  { %1600 = vtanh.f32 %v932_v63  ;;  %v1151_v63 = vunpack.c.h.bf16 %v1048_v14 }
 0x665   :  { %v1601_v24 = vpop.eup %1600 }
 0x666   :  { %v935_v32 = vmul.f32 %v1601_v24, %v934_v21 }
 0x668   :  { %v937_v34 = vadd.f32 %v936_v27, %v935_v32  ;;  %v1160_v27 = vunpack.c.l.bf16 %v1168_v0 }
 0x66a   :  { %v2167_v35 = vsel %vm945_vm14, %v937_v34, %v2120_v56  ;;  %v1040_v56 = vunpack.c.h.bf16 %v2158_v6 }
 0x66b   :  { %v947_v36 = vpack.c.bf16 %v2167_v35, %v2167_v35 }
 0x66d   :  { %981 = vmatmul.mubr.bf16.vlgmr.msra.gmra.mrb[24].mxu0 %v947_v36  ;;  %1476 = vmatmul.mubr.bf16.vlgmr.msra.gmra.mrb[24].mxu1 %v947_v36 }
 0x66e   :  { %1069 = vmatpush1.bf16.msra.mxu0 %v1623_v38  ;;  %1480 = vmatpush3.bf16.msra.mxu1 %v1624_v39 }
 0x66f   :  { %1070 = vmatprep.subr.bf16.mxu0 %v1625_v40  ;;  %1481 = vmatprep.subr.bf16.mxu1 %v1724_v3 }
 0x670   :  { %1100 = vmatprep.mubr.bf16.mxu0 %v1725_v4  ;;  %1495 = vmatprep.mubr.msk.bf16.mxu1 %vm1726_vm0, %v1724_v3  ;;  %v1632_v4 = vld [vmem:[#allocation8 + $0x48] ss:$12 sps:$4 sm:$0xff]  }
 0x672   :  { %1071 = vmatpush1.bf16.msra.mxu0 %v1626_v41  ;;  %1482 = vmatpush3.bf16.msra.mxu1 %v1627_v1 }
 0x673   :  { %1072 = vmatprep.subr.bf16.mxu0 %v1628_v42  ;;  %1483 = vmatprep.subr.bf16.mxu1 %v1724_v3 }
 0x676   :  { %1073 = vmatpush1.bf16.msra.mxu0 %v1629_v43  ;;  %1484 = vmatpush3.bf16.msra.mxu1 %v1630_v44 }
 0x677   :  { %1074 = vmatprep.subr.bf16.mxu0 %v1631_v45  ;;  %1485 = vmatprep.subr.bf16.mxu1 %v1724_v3 }
 0x67a   :  { %1075 = vmatpush1.bf16.msra.mxu0 %v1632_v4  ;;  %1486 = vmatpush3.bf16.msra.mxu1 %v1633_v46  ;;  %v1169_v4 = vunpack.c.h.bf16 %v1168_v0 }
 0x67b   :  { %1076 = vmatprep.subr.bf16.mxu0 %v1634_v30  ;;  %1487 = vmatprep.subr.bf16.mxu1 %v1724_v3 }
 0x67e   :  { %1077 = vmatpush1.bf16.msra.mxu0 %v1635_v47  ;;  %1488 = vmatpush3.bf16.msra.mxu1 %v1636_v19 }
 0x67f   :  { %1078 = vmatprep.subr.bf16.mxu0 %v1637_v48  ;;  %1489 = vmatprep.subr.bf16.mxu1 %v1724_v3 }
 0x682   :  { %1079 = vmatpush1.bf16.msra.mxu0 %v1638_v49  ;;  %1490 = vmatpush3.bf16.msra.mxu1 %v1868_v28 }
 0x683   :  { %1080 = vmatprep.subr.bf16.mxu0 %v1639_v50  ;;  %1491 = vmatprep.subr.bf16.mxu1 %v1724_v3 }
 0x686   :  { %1081 = vmatpush1.bf16.msra.mxu0 %v1640_v51  ;;  %1492 = vmatpush3.bf16.msra.mxu1 %v1878_v31  ;;  %v1184_v51 = vpop.permute.xlu1 %1183 }
 0x687   :  { %1082 = vmatprep.subr.bf16.mxu0 %v1641_v53  ;;  %1493 = vmatprep.subr.bf16.mxu1 %v1724_v3  ;;  %vm1185_vm0 = vcmp.eq.s32.totalorder %v1184_v51, 1 }
 0x68a   :  { %1083 = vmatpush1.bf16.msra.mxu0 %v1642_v37  ;;  %1494 = vmatpush3.bf16.msra.mxu1 %v1884_v33 }
 0x740   :  { %v982_v55 = vpop.f32.mrb[24].mxu0  ;;  %v1023_v28 = vpop.f32.mrb[24].mxu1 }
 0x741   :  { %v1032_v57 = vadd.f32 %v1031_v54, %v982_v55  ;;  %v984_v2 = vpop.f32.mrb[25].mxu0  ;;  %v1477_v5 = vpop.f32.mrb[25].mxu1  ;;  %v1050_v6 = vadd.f32 %v1927_v52, %v1023_v28 }
 0x742   :  { %v986_v7 = vpop.f32.mrb[26].mxu0  ;;  %v1026_v8 = vpop.f32.mrb[26].mxu1  ;;  %v1041_v11 = vadd.f32 %v1040_v56, %v984_v2 }
 0x743   :  { %v1260_v31 = vmul.f32 -1.442695, %v1032_v57  ;;  %v987_v9 = vpop.f32.mrb[27].mxu0  ;;  %v1478_v10 = vpop.f32.mrb[27].mxu1 }
 0x744   :  { %v1261_v3 = vmul.f32 -1.442695, %v1041_v11 }
 0x745   :  { %1602 = vpow2.f32 %v1260_v31 }
 0x746   :  { %1604 = vpow2.f32 %v1261_v3 }
 0x74f   :  { %v1603_v12 = vpop.eup %1602 }
 0x750   :  { %v1036_v33 = vadd.f32 1.0, %v1603_v12  ;;  %v1605_v13 = vpop.eup %1604 }
 0x751   :  { %v1045_v15 = vadd.f32 1.0, %v1605_v13 }
 0x752   :  { %1606 = vrcp.f32 %v1036_v33 }
 0x753   :  { %1608 = vrcp.f32 %v1045_v15 }
 0x75c   :  { %v1607_v17 = vpop.eup %1606 }
 0x75d   :  { %v1051_v18 = vmul.f32 %v1607_v17, %v1050_v6  ;;  %v1609_v22 = vpop.eup %1608 }
 0x75e   :  { %v1054_v23 = vsub.f32 1.0, %v1609_v22  ;;  %v1056_v58 = vmul.f32 %v1609_v22, %v2167_v35 }
 0x75f   :  { %v1052_v20 = vadd.f32 %v1051_v18, %v1049_v16 }
 0x761   :  { %1610 = vtanh.f32 %v1052_v20 }
 0x76b   :  { %v1611_v25 = vpop.eup %1610 }
 0x76c   :  { %v1055_v59 = vmul.f32 %v1611_v25, %v1054_v23 }
 0x76e   :  { %v1057_v60 = vadd.f32 %v1056_v58, %v1055_v59 }
 0x770   :  { %v1066_v61 = vsel %vm1065_vm15, %v1057_v60, %v2167_v35 }
 0x771   :  { %v1067_v62 = vpack.c.bf16 %v1066_v61, %v1066_v61 }
 0x773   :  { %1101 = vmatmul.mubr.bf16.vlgmr.msra.gmra.mrb[28].mxu0 %v1067_v62  ;;  %1496 = vmatmul.mubr.bf16.vlgmr.msra.gmra.mrb[28].mxu1 %v1067_v62 }
 0x846   :  { %v1102_v21 = vpop.f32.mrb[28].mxu0  ;;  %v1143_v24 = vpop.f32.mrb[28].mxu1 }
 0x847   :  { %v1152_v32 = vadd.f32 %v1151_v63, %v1102_v21  ;;  %v1104_v29 = vpop.f32.mrb[29].mxu0  ;;  %v1497_v34 = vpop.f32.mrb[29].mxu1  ;;  %v1170_v46 = vadd.f32 %v1927_v52, %v1143_v24 }
 0x848   :  { %v1106_v36 = vpop.f32.mrb[30].mxu0  ;;  %v1146_v38 = vpop.f32.mrb[30].mxu1  ;;  %v1161_v1 = vadd.f32 %v1160_v27, %v1104_v29 }
 0x849   :  { %v1263_v39 = vmul.f32 -1.442695, %v1152_v32  ;;  %v1107_v40 = vpop.f32.mrb[31].mxu0  ;;  %v1498_v41 = vpop.f32.mrb[31].mxu1 }
 0x84a   :  { %v1264_v42 = vmul.f32 -1.442695, %v1161_v1 }
 0x84b   :  { %1612 = vpow2.f32 %v1263_v39 }
 0x84c   :  { %1614 = vpow2.f32 %v1264_v42 }
 0x855   :  { %v1613_v35 = vpop.eup %1612 }
 0x856   :  { %v1156_v43 = vadd.f32 1.0, %v1613_v35  ;;  %v1615_v44 = vpop.eup %1614 }
 0x857   :  { %v1165_v45 = vadd.f32 1.0, %v1615_v44 }
 0x858   :  { %1616 = vrcp.f32 %v1156_v43 }
 0x859   :  { %1618 = vrcp.f32 %v1165_v45 }
 0x862   :  { %v1617_v30 = vpop.eup %1616 }
 0x863   :  { %v1171_v47 = vmul.f32 %v1617_v30, %v1170_v46  ;;  %v1619_v48 = vpop.eup %1618 }
 0x864   :  { %v1174_v49 = vsub.f32 1.0, %v1619_v48  ;;  %v1176_v37 = vmul.f32 %v1619_v48, %v1066_v61 }
 0x865   :  { %v1172_v19 = vadd.f32 %v1171_v47, %v1169_v4 }
 0x867   :  { %1620 = vtanh.f32 %v1172_v19 }
 0x871   :  { %v1621_v50 = vpop.eup %1620 }
 0x872   :  { %v1175_v53 = vmul.f32 %v1621_v50, %v1174_v49 }
 0x874   :  { %v1177_v54 = vadd.f32 %v1176_v37, %v1175_v53 }
 0x876   :  { %v1186_v55 = vsel %vm1185_vm0, %v1177_v54, %v1066_v61 }
 0x877   :  { %1187 = vst [vmem:[#allocation2] sm:$0xff] %v1186_v55 }
 0x878 PF:  { %s1727_s4 = smov [#allocation10]  }
 0x879   :  { %s1205_s21 = sshll.u32 %s1727_s4, 4  ;;  %s1206_s21 = int_to_ptr.vmem [resolvable:$true] %s1205_s21 }
 0x87a   :  { %s1691_s22 = scalar_lea.vmem %s1206_s21, 128  ;;  %p1696_p4 = scmp.lt.s32.totalorder %s1206_s21, %s1206_s21 }
 0x87b   :  { %p1692_p3 = scmp.ne.s32.totalorder %s1206_s21, %s1691_s22  ;;  %p1697_p5 = scmp.lt.s32.totalorder %s1691_s22, %s1691_s22 }
 0x87d   :  { %p1698_p6 = por %p1697_p5, %p1696_p4 }
 0x87e   :  { %v1191_v28 = vld [vmem:[#allocation2] sm:$0xff] }
 0x87f   :  { %v1266_v56 = vmul.f32 -1.442695, %v1191_v28  ;;  %p1699_p7 = pnand %p1698_p6, %p1692_p3 }
 0x881   :  { %1643 = vpow2.f32 %v1266_v56 }
 0x88b   :  { %v1644_v52 = vpop.eup %1643 }
 0x88c   :  { %v1195_v57 = vadd.f32 1.0, %v1644_v52 }
 0x88e   :  { %1645 = vrcp.f32 %v1195_v57 }
 0x898   :  { %v1646_v2 = vpop.eup %1645 }
 0x899   :  { %1198 = vst [vmem:[#allocation10] sm:$0xff] %v1646_v2 }
 0x89a   :  { %1702 = shalt.err (!%p1699_p7)
}
 0x89b   :  { %s1703_s25 = scalar_lea.hbm %s2207_s5, 128 }
 0x89c   :  { %p1704_p8 = scmp.ne.s32.totalorder %s2207_s5, %s1703_s25  ;;  %p1707_p9 = scmp.lt.u32.totalorder %s1703_s25, %s2207_s5 }
 0x89e   :  { %p1709_p10 = pnand %p1707_p9, %p1704_p8 }
 0x8a0   :  { %1712 = shalt.err (!%p1709_p10)
}
 0x8a1   :  { %1208 = dma.vmem_to_hbm [thread:$0]  %s1206_s21, 128, %s2207_s5, [#allocation7]  }
 0x8a2   :  { %1717 = dma.done.wait [#allocation7], 128  }
 0x8a3   :  { %1718 = vsyncadd [#allocation7], 4294967168 }
 0x8a4   :  { %1212 = vsyncpa [#allocation6], 1 }
 0x8a5   :  { %1213 = vsyncpa [#allocation9], 1 }
 0x8a6   :  { %1214 = vsyncpa [#allocation7], 1 }

</bundles_post_ra>
